<compile_context>
chip_gen: v7x
topology: tpu7x:2x2x1
jax: 0.10.0
libtpu: 0.0.40
codegen_flags: <defaults>
</compile_context>

<pallas_src>
import functools

import jax
import jax.numpy as jnp
from jax import lax
from jax.experimental import pallas as pl
from jax.experimental.pallas import tpu as pltpu

HALO = 2          # spatial halo required by the 5x5 conv (and 3x3 / pool)
NEG = -1e30       # "-inf" padding value for the 3x3 max-pool
NTAPS = 25        # 5x5 offset grid (the 3x3 taps live in its inner 3x3)


# ----------------------------------------------------------------------------
# Fused Inception-block kernel (one grid step == one batch element)
# ----------------------------------------------------------------------------
def _inception_kernel(xn_ref, mask_ref, wz_ref, bz_ref, wbig_ref, bout_ref,
                      o_ref, a_ref, xs_ref, rs_ref, *, Wp, K0, MARG):
    # xn_ref  : (1, Cin, NF)   flattened padded input, -1e30 spatial halo
    # mask_ref: (1, NF)        1.0 at interior positions, 0.0 at the halo
    # wz_ref  : (8, Cin)       merged [b2a | b3a | 0] 1x1 reduce weights (BN folded)
    # bz_ref  : (8, 1)         merged reduce bias
    # wbig_ref: (Ctot, Ktot)   stacked weights for the single big matmul
    # bout_ref: (Ctot, 1)      folded output biases (concat channel order)
    # o_ref   : (1, Ctot, NF)
    # a_ref   : (Ktot, NF)     stacked activation matrix (VMEM scratch)
    # xs_ref  : (Cin, NSTAGE)  margin-padded staging copy of x (pool shifts)
    # rs_ref  : (8, NSTAGE)    margin-padded staging copy of r (conv taps)
    cin = xn_ref.shape[1]
    nf = xn_ref.shape[2]

    xn = xn_ref[0]                          # (Cin, NF)
    m = mask_ref[...]                       # (1, NF)
    x0 = xn * m                             # zero-halo copy (keeps A finite)

    # ---- stage x (with zeroed flat margins) for the shifted pool reads -----
    xs_ref[:, 0:MARG] = jnp.zeros((cin, MARG), jnp.float32)
    xs_ref[:, MARG + nf:MARG + nf + MARG] = jnp.zeros((cin, MARG), jnp.float32)
    xs_ref[:, MARG:MARG + nf] = xn

    # ---- branch 1: 1x1 conv activations are just x ---------------------------
    a_ref[0:cin, :] = x0

    # ---- branch 4: 3x3/s1/p1 max-pool; -1e30 halo == -inf padding, so the 8
    #      neighbour reads are plain unmasked maxes ----------------------------
    pooled = xn
    for dh in (-1, 0, 1):
        for dw in (-1, 0, 1):
            if dh == 0 and dw == 0:
                continue
            s = MARG + dh * Wp + dw
            pooled = jnp.maximum(pooled, xs_ref[:, s:s + nf])
    a_ref[cin:2 * cin, :] = pooled * m

    if 2 * cin < K0:                        # keep any unused pad rows finite
        a_ref[2 * cin:K0, :] = jnp.zeros((K0 - 2 * cin, nf), jnp.float32)

    # ---- merged branch-2/3 1x1 reduce (BN folded); interior mask supplies the
    #      zero padding the 3x3/5x5 convolution sees ---------------------------
    r = jnp.dot(wz_ref[...], x0, preferred_element_type=jnp.float32)
    r = jnp.maximum(r + bz_ref[...], 0.0) * m            # (8, NF)

    rs_ref[:, 0:MARG] = jnp.zeros((8, MARG), jnp.float32)
    rs_ref[:, MARG + nf:MARG + nf + MARG] = jnp.zeros((8, MARG), jnp.float32)
    rs_ref[:, MARG:MARG + nf] = r

    # ---- 25 shifted copies of r -> stacked activation rows (8-aligned) -------
    for dh in range(-2, 3):
        for dw in range(-2, 3):
            t = (dh + 2) * 5 + (dw + 2)
            s = MARG + dh * Wp + dw
            a_ref[K0 + 8 * t:K0 + 8 * (t + 1), :] = rs_ref[:, s:s + nf]

    # ---- ONE stacked MXU matmul for all four branches + bias + ReLU ----------
    acc = jnp.dot(wbig_ref[...], a_ref[...], preferred_element_type=jnp.float32)
    o_ref[0] = jnp.maximum(acc + bout_ref[...], 0.0)


# ----------------------------------------------------------------------------
# Wrapper (pallas_call plumbing) — NCHW in, NCHW out, no transposes
# ----------------------------------------------------------------------------
def inception_block_pallas(x_nchw, P):
    wbig, wz, bz, bout = P["wbig"], P["wz"], P["bz"], P["bout"]
    N, Cin, H, W = x_nchw.shape
    Ctot, Ktot = wbig.shape
    K0 = Ktot - NTAPS * 8

    Hp = H + 2 * HALO
    Wp = W + 2 * HALO
    while (Hp * Wp) % 128 != 0:        # lane-dense, unmasked output stores
        Wp += 1
    NF = Hp * Wp
    MARG = -(-(2 * Wp + 2) // 128) * 128   # covers |shift| <= 2*Wp + 2
    NSTAGE = NF + 2 * MARG

    # single small spatial pad of the input (supplies both the conv halo and
    # the pool's -inf padding); every intermediate stays in VMEM.
    xp = jnp.pad(x_nchw, ((0, 0), (0, 0),
                          (HALO, Hp - H - HALO), (HALO, Wp - W - HALO)),
                 constant_values=NEG)
    xp = xp.reshape(N, Cin, NF)
    mask = jnp.zeros((Hp, Wp), jnp.float32).at[HALO:HALO + H,
                                               HALO:HALO + W].set(1.0)
    mask = mask.reshape(1, NF)

    kernel = functools.partial(_inception_kernel, Wp=Wp, K0=K0, MARG=MARG)
    out = pl.pallas_call(
        kernel,
        out_shape=jax.ShapeDtypeStruct((N, Ctot, NF), jnp.float32),
        grid=(N,),
        in_specs=[
            pl.BlockSpec((1, Cin, NF), lambda n: (n, 0, 0)),
            pl.BlockSpec((1, NF), lambda n: (0, 0)),
            pl.BlockSpec((8, Cin), lambda n: (0, 0)),
            pl.BlockSpec((8, 1), lambda n: (0, 0)),
            pl.BlockSpec((Ctot, Ktot), lambda n: (0, 0)),
            pl.BlockSpec((Ctot, 1), lambda n: (0, 0)),
        ],
        out_specs=pl.BlockSpec((1, Ctot, NF), lambda n: (n, 0, 0)),
        scratch_shapes=[
            pltpu.VMEM((Ktot, NF), jnp.float32),      # stacked activations
            pltpu.VMEM((Cin, NSTAGE), jnp.float32),   # staged x  (pool)
            pltpu.VMEM((8, NSTAGE), jnp.float32),     # staged r  (conv taps)
        ],
        compiler_params=pltpu.CompilerParams(
            dimension_semantics=("parallel",)),
    )(xp, mask, wz, bz[:, None], wbig, bout[:, None])

    out = out.reshape(N, Ctot, Hp, Wp)[:, :, HALO:HALO + H, HALO:HALO + W]
    return out


# ----------------------------------------------------------------------------
# Parameter construction (deterministic, synthetic) + BatchNorm folding
# ----------------------------------------------------------------------------
def make_conv_block_raw(key, cin, cout, k):
    kw_, kb, kg, kbe, km, kv = jax.random.split(key, 6)
    w = 0.1 * jax.random.normal(kw_, (cout, cin, k, k), jnp.float32)   # OIHW
    b = 0.1 * jax.random.normal(kb, (cout,), jnp.float32)
    gamma = 1.0 + 0.1 * jax.random.normal(kg, (cout,), jnp.float32)
    beta = 0.1 * jax.random.normal(kbe, (cout,), jnp.float32)
    mean = 0.1 * jax.random.normal(km, (cout,), jnp.float32)
    var = 0.5 + jnp.abs(jax.random.normal(kv, (cout,), jnp.float32))
    eps = 1e-5
    # TODO(synk): BatchNorm is folded in inference (running-stats) mode; a
    # PyTorch module in train() mode would use per-batch statistics instead.
    scale = gamma / jnp.sqrt(var + eps)
    bias = (b - mean) * scale + beta
    return dict(w=w, b=b, scale=scale, bias=bias, k=k)


def build_fused_params(R, in_ch, num1x1, n3red, n3, n5red, n5, pool_proj):
    """Fold BN into weights and bake the concat + stacked-matmul layout in."""
    Ctot = num1x1 + n3 + n5 + pool_proj
    cred = n3red + n5red
    assert cred <= 8, "reduce channels must fit one 8-sublane slab"
    K0 = ((2 * in_ch + 7) // 8) * 8
    Ktot = K0 + NTAPS * 8

    def scaled_1x1(raw):                       # (cout, cin), BN scale folded
        return raw["w"][:, :, 0, 0] * raw["scale"][:, None]

    # Merged 1x1 reduce: output rows [b2a | b3a | zero-pad].
    wz = jnp.zeros((8, in_ch), jnp.float32)
    wz = wz.at[:n3red].set(scaled_1x1(R["b2a"]))
    wz = wz.at[n3red:cred].set(scaled_1x1(R["b3a"]))
    bz = jnp.zeros((8,), jnp.float32)
    bz = bz.at[:n3red].set(R["b2a"]["bias"])
    bz = bz.at[n3red:cred].set(R["b3a"]["bias"])

    w3 = R["b2b"]["w"] * R["b2b"]["scale"][:, None, None, None]  # (n3,n3red,3,3)
    w5 = R["b3b"]["w"] * R["b3b"]["scale"][:, None, None, None]  # (n5,n5red,5,5)

    # Single stacked weight matrix: columns [x | pooled | 25 tap slabs].
    wbig = jnp.zeros((Ctot, Ktot), jnp.float32)
    wbig = wbig.at[:num1x1, 0:in_ch].set(scaled_1x1(R["b1"]))
    wbig = wbig.at[Ctot - pool_proj:, in_ch:2 * in_ch].set(scaled_1x1(R["b4"]))
    for dh in range(-2, 3):
        for dw in range(-2, 3):
            t = (dh + 2) * 5 + (dw + 2)
            base = K0 + 8 * t
            wbig = wbig.at[num1x1 + n3:num1x1 + n3 + n5,
                           base + n3red:base + cred].set(w5[:, :, dh + 2, dw + 2])
            if abs(dh) <= 1 and abs(dw) <= 1:
                wbig = wbig.at[num1x1:num1x1 + n3,
                               base:base + n3red].set(w3[:, :, dh + 1, dw + 1])

    bout = jnp.concatenate([R["b1"]["bias"], R["b2b"]["bias"],
                            R["b3b"]["bias"], R["b4"]["bias"]])
    return dict(wbig=wbig, wz=wz, bz=bz, bout=bout)


# ----------------------------------------------------------------------------
# Pure-JAX reference (for verification)
# ----------------------------------------------------------------------------
def ref_conv_block(x_nhwc, raw, pad):
    w_hwio = jnp.transpose(raw["w"], (2, 3, 1, 0))
    y = lax.conv_general_dilated(
        x_nhwc, w_hwio, window_strides=(1, 1),
        padding=[(pad, pad), (pad, pad)],
        dimension_numbers=("NHWC", "HWIO", "NHWC"))
    y = y * raw["scale"] + raw["bias"]
    return jnp.maximum(y, 0.0)


def ref_inception(x_nchw, R):
    x = jnp.transpose(x_nchw, (0, 2, 3, 1))
    b1 = ref_conv_block(x, R["b1"], 0)
    b2 = ref_conv_block(ref_conv_block(x, R["b2a"], 0), R["b2b"], 1)
    b3 = ref_conv_block(ref_conv_block(x, R["b3a"], 0), R["b3b"], 2)
    pooled = lax.reduce_window(
        x, -jnp.inf, lax.max, (1, 3, 3, 1), (1, 1, 1, 1),
        padding=[(0, 0), (1, 1), (1, 1), (0, 0)])
    b4 = ref_conv_block(pooled, R["b4"], 0)
    out = jnp.concatenate([b1, b2, b3, b4], axis=-1)
    return jnp.transpose(out, (0, 3, 1, 2))


# ----------------------------------------------------------------------------
if __name__ == "__main__":
    key = jax.random.PRNGKey(0)
    k_x, k1, k2a, k2b, k3a, k3b, k4 = jax.random.split(key, 7)

    # InceptionBlock(in_ch=4, num1x1=4, num_3x3_red=4, num_3x3=8,
    #                num_5x5_red=2, num_5x5=4, pool_proj=4)
    in_ch, num1x1 = 4, 4
    num_3x3_red, num_3x3 = 4, 8
    num_5x5_red, num_5x5 = 2, 4
    pool_proj = 4
    N, H, W = 2, 16, 16

    x = jax.random.normal(k_x, (N, in_ch, H, W), jnp.float32)  # NCHW like PyTorch

    R = {
        "b1": make_conv_block_raw(k1, in_ch, num1x1, 1),
        "b2a": make_conv_block_raw(k2a, in_ch, num_3x3_red, 1),
        "b2b": make_conv_block_raw(k2b, num_3x3_red, num_3x3, 3),
        "b3a": make_conv_block_raw(k3a, in_ch, num_5x5_red, 1),
        "b3b": make_conv_block_raw(k3b, num_5x5_red, num_5x5, 5),
        "b4": make_conv_block_raw(k4, in_ch, pool_proj, 1),
    }
    P = build_fused_params(R, in_ch, num1x1, num_3x3_red, num_3x3,
                           num_5x5_red, num_5x5, pool_proj)

    out = jax.block_until_ready(inception_block_pallas(x, P))

    expected_c = num1x1 + num_3x3 + num_5x5 + pool_proj
    assert out.shape == (N, expected_c, H, W), out.shape

    ref = jax.block_until_ready(ref_inception(x, R))
    assert jnp.allclose(out, ref, rtol=1e-3, atol=1e-3), float(
        jnp.max(jnp.abs(out - ref)))

    print("KERNEL_OK")
</pallas_src>

<mosaic_0001>
module attributes {stable_mosaic.version = 11 : i64} {
  func.func @_inception_kernel(%arg0: i32, %arg1: memref<1x4x640xf32, #tpu.memory_space<vmem>>, %arg2: memref<1x640xf32, #tpu.memory_space<vmem>>, %arg3: memref<8x4xf32, #tpu.memory_space<vmem>>, %arg4: memref<8x1xf32, #tpu.memory_space<vmem>>, %arg5: memref<20x208xf32, #tpu.memory_space<vmem>>, %arg6: memref<20x1xf32, #tpu.memory_space<vmem>>, %arg7: memref<1x20x640xf32, #tpu.memory_space<vmem>>, %arg8: memref<208x640xf32, #tpu.memory_space<vmem>>, %arg9: memref<4x896xf32, #tpu.memory_space<vmem>>, %arg10: memref<8x896xf32, #tpu.memory_space<vmem>>) attributes {dimension_semantics = [#tpu.dimension_semantics<parallel>], iteration_bounds = array<i64: 2>, scalar_prefetch = 0 : i64, scratch_operands = 3 : i64, tpu.core_type = #tpu.core_type<tc>, window_params = [{transform_indices = @transform_0, window_bounds = array<i64: 1, 4, 640>}, {pipeline_mode = #tpu.pipeline_mode<synchronous>, transform_indices = @transform_1, window_bounds = array<i64: 1, 640>}, {pipeline_mode = #tpu.pipeline_mode<synchronous>, transform_indices = @transform_2, window_bounds = array<i64: 8, 4>}, {pipeline_mode = #tpu.pipeline_mode<synchronous>, transform_indices = @transform_3, window_bounds = array<i64: 8, 1>}, {pipeline_mode = #tpu.pipeline_mode<synchronous>, transform_indices = @transform_4, window_bounds = array<i64: 20, 208>}, {pipeline_mode = #tpu.pipeline_mode<synchronous>, transform_indices = @transform_5, window_bounds = array<i64: 20, 1>}, {transform_indices = @transform_6, window_bounds = array<i64: 1, 20, 640>}]} {
    %c0 = arith.constant 0 : index
    %c0_0 = arith.constant 0 : index
    %c0_1 = arith.constant 0 : index
    %0 = vector.load %arg1[%c0, %c0_0, %c0_1] : memref<1x4x640xf32, #tpu.memory_space<vmem>>, vector<1x4x640xf32>
    %1 = vector.shape_cast %0 : vector<1x4x640xf32> to vector<4x640xf32>
    %c0_2 = arith.constant 0 : index
    %c0_3 = arith.constant 0 : index
    %2 = vector.load %arg2[%c0_2, %c0_3] : memref<1x640xf32, #tpu.memory_space<vmem>>, vector<1x640xf32>
    %3 = vector.broadcast %2 : vector<1x640xf32> to vector<4x640xf32>
    %4 = arith.mulf %1, %3 : vector<4x640xf32>
    %cst = arith.constant 0.000000e+00 : f32
    %5 = vector.broadcast %cst : f32 to vector<4x128xf32>
    %c0_4 = arith.constant 0 : index
    %c0_5 = arith.constant 0 : index
    %6 = vector.load %arg9[%c0_4, %c0_5] : memref<4x896xf32, #tpu.memory_space<vmem>>, vector<4x128xf32>
    tpu.vector_store %arg9[%c0_4, %c0_5], %5 {strides = array<i32>} : memref<4x896xf32, #tpu.memory_space<vmem>>, vector<4x128xf32>,
    %cst_6 = arith.constant 0.000000e+00 : f32
    %7 = vector.broadcast %cst_6 : f32 to vector<4x128xf32>
    %c0_7 = arith.constant 0 : index
    %c768 = arith.constant 768 : index
    %8 = vector.load %arg9[%c0_7, %c768] : memref<4x896xf32, #tpu.memory_space<vmem>>, vector<4x128xf32>
    tpu.vector_store %arg9[%c0_7, %c768], %7 {strides = array<i32>} : memref<4x896xf32, #tpu.memory_space<vmem>>, vector<4x128xf32>,
    %c0_8 = arith.constant 0 : index
    %c128 = arith.constant 128 : index
    %9 = vector.load %arg9[%c0_8, %c128] : memref<4x896xf32, #tpu.memory_space<vmem>>, vector<4x640xf32>
    tpu.vector_store %arg9[%c0_8, %c128], %1 {strides = array<i32>} : memref<4x896xf32, #tpu.memory_space<vmem>>, vector<4x640xf32>,
    %c0_9 = arith.constant 0 : index
    %c0_10 = arith.constant 0 : index
    %10 = vector.load %arg8[%c0_9, %c0_10] : memref<208x640xf32, #tpu.memory_space<vmem>>, vector<4x640xf32>
    tpu.vector_store %arg8[%c0_9, %c0_10], %4 {strides = array<i32>} : memref<208x640xf32, #tpu.memory_space<vmem>>, vector<4x640xf32>,
    %c0_11 = arith.constant 0 : index
    %c95 = arith.constant 95 : index
    %11 = vector.load %arg9[%c0_11, %c95] : memref<4x896xf32, #tpu.memory_space<vmem>>, vector<4x640xf32>
    %12 = arith.maximumf %1, %11 : vector<4x640xf32>
    %c0_12 = arith.constant 0 : index
    %c96 = arith.constant 96 : index
    %13 = vector.load %arg9[%c0_12, %c96] : memref<4x896xf32, #tpu.memory_space<vmem>>, vector<4x640xf32>
    %14 = arith.maximumf %12, %13 : vector<4x640xf32>
    %c0_13 = arith.constant 0 : index
    %c97 = arith.constant 97 : index
    %15 = vector.load %arg9[%c0_13, %c97] : memref<4x896xf32, #tpu.memory_space<vmem>>, vector<4x640xf32>
    %16 = arith.maximumf %14, %15 : vector<4x640xf32>
    %c0_14 = arith.constant 0 : index
    %c127 = arith.constant 127 : index
    %17 = vector.load %arg9[%c0_14, %c127] : memref<4x896xf32, #tpu.memory_space<vmem>>, vector<4x640xf32>
    %18 = arith.maximumf %16, %17 : vector<4x640xf32>
    %c0_15 = arith.constant 0 : index
    %c129 = arith.constant 129 : index
    %19 = vector.load %arg9[%c0_15, %c129] : memref<4x896xf32, #tpu.memory_space<vmem>>, vector<4x640xf32>
    %20 = arith.maximumf %18, %19 : vector<4x640xf32>
    %c0_16 = arith.constant 0 : index
    %c159 = arith.constant 159 : index
    %21 = vector.load %arg9[%c0_16, %c159] : memref<4x896xf32, #tpu.memory_space<vmem>>, vector<4x640xf32>
    %22 = arith.maximumf %20, %21 : vector<4x640xf32>
    %c0_17 = arith.constant 0 : index
    %c160 = arith.constant 160 : index
    %23 = vector.load %arg9[%c0_17, %c160] : memref<4x896xf32, #tpu.memory_space<vmem>>, vector<4x640xf32>
    %24 = arith.maximumf %22, %23 : vector<4x640xf32>
    %c0_18 = arith.constant 0 : index
    %c161 = arith.constant 161 : index
    %25 = vector.load %arg9[%c0_18, %c161] : memref<4x896xf32, #tpu.memory_space<vmem>>, vector<4x640xf32>
    %26 = arith.maximumf %24, %25 : vector<4x640xf32>
    %27 = vector.broadcast %2 : vector<1x640xf32> to vector<4x640xf32>
    %28 = arith.mulf %26, %27 : vector<4x640xf32>
    %c4 = arith.constant 4 : index
    %c0_19 = arith.constant 0 : index
    %29 = vector.load %arg8[%c4, %c0_19] : memref<208x640xf32, #tpu.memory_space<vmem>>, vector<4x640xf32>
    tpu.vector_store %arg8[%c4, %c0_19], %28 {strides = array<i32>} : memref<208x640xf32, #tpu.memory_space<vmem>>, vector<4x640xf32>,
    %c0_20 = arith.constant 0 : index
    %c0_21 = arith.constant 0 : index
    %30 = vector.load %arg3[%c0_20, %c0_21] : memref<8x4xf32, #tpu.memory_space<vmem>>, vector<8x4xf32>
    %cst_22 = arith.constant dense<0.000000e+00> : vector<8x640xf32>
    %31 = tpu.matmul %30, %4, %cst_22 {dimension_numbers = #tpu.dot_dimension_numbers<[1], [0], [0], [1], [0, 0, 1, 1], [], []>} : vector<8x4xf32>, vector<4x640xf32>, vector<8x640xf32> -> vector<8x640xf32>
    %c0_23 = arith.constant 0 : index
    %c0_24 = arith.constant 0 : index
    %32 = vector.load %arg4[%c0_23, %c0_24] : memref<8x1xf32, #tpu.memory_space<vmem>>, vector<8x1xf32>
    %33 = vector.broadcast %32 : vector<8x1xf32> to vector<8x640xf32>
    %34 = arith.addf %31, %33 : vector<8x640xf32>
    %cst_25 = arith.constant 0.000000e+00 : f32
    %35 = vector.broadcast %cst_25 : f32 to vector<8x640xf32>
    %36 = arith.maximumf %34, %35 : vector<8x640xf32>
    %37 = vector.broadcast %2 : vector<1x640xf32> to vector<8x640xf32>
    %38 = arith.mulf %36, %37 : vector<8x640xf32>
    %cst_26 = arith.constant 0.000000e+00 : f32
    %39 = vector.broadcast %cst_26 : f32 to vector<8x128xf32>
    %c0_27 = arith.constant 0 : index
    %c0_28 = arith.constant 0 : index
    %40 = vector.load %arg10[%c0_27, %c0_28] : memref<8x896xf32, #tpu.memory_space<vmem>>, vector<8x128xf32>
    tpu.vector_store %arg10[%c0_27, %c0_28], %39 {strides = array<i32>} : memref<8x896xf32, #tpu.memory_space<vmem>>, vector<8x128xf32>,
    %cst_29 = arith.constant 0.000000e+00 : f32
    %41 = vector.broadcast %cst_29 : f32 to vector<8x128xf32>
    %c0_30 = arith.constant 0 : index
    %c768_31 = arith.constant 768 : index
    %42 = vector.load %arg10[%c0_30, %c768_31] : memref<8x896xf32, #tpu.memory_space<vmem>>, vector<8x128xf32>
    tpu.vector_store %arg10[%c0_30, %c768_31], %41 {strides = array<i32>} : memref<8x896xf32, #tpu.memory_space<vmem>>, vector<8x128xf32>,
    %c0_32 = arith.constant 0 : index
    %c128_33 = arith.constant 128 : index
    %43 = vector.load %arg10[%c0_32, %c128_33] : memref<8x896xf32, #tpu.memory_space<vmem>>, vector<8x640xf32>
    tpu.vector_store %arg10[%c0_32, %c128_33], %38 {strides = array<i32>} : memref<8x896xf32, #tpu.memory_space<vmem>>, vector<8x640xf32>,
    %c0_34 = arith.constant 0 : index
    %c62 = arith.constant 62 : index
    %44 = vector.load %arg10[%c0_34, %c62] : memref<8x896xf32, #tpu.memory_space<vmem>>, vector<8x640xf32>
    %c8 = arith.constant 8 : index
    %c0_35 = arith.constant 0 : index
    %45 = vector.load %arg8[%c8, %c0_35] : memref<208x640xf32, #tpu.memory_space<vmem>>, vector<8x640xf32>
    tpu.vector_store %arg8[%c8, %c0_35], %44 {strides = array<i32>} : memref<208x640xf32, #tpu.memory_space<vmem>>, vector<8x640xf32>,
    %c0_36 = arith.constant 0 : index
    %c63 = arith.constant 63 : index
    %46 = vector.load %arg10[%c0_36, %c63] : memref<8x896xf32, #tpu.memory_space<vmem>>, vector<8x640xf32>
    %c16 = arith.constant 16 : index
    %c0_37 = arith.constant 0 : index
    %47 = vector.load %arg8[%c16, %c0_37] : memref<208x640xf32, #tpu.memory_space<vmem>>, vector<8x640xf32>
    tpu.vector_store %arg8[%c16, %c0_37], %46 {strides = array<i32>} : memref<208x640xf32, #tpu.memory_space<vmem>>, vector<8x640xf32>,
    %c0_38 = arith.constant 0 : index
    %c64 = arith.constant 64 : index
    %48 = vector.load %arg10[%c0_38, %c64] : memref<8x896xf32, #tpu.memory_space<vmem>>, vector<8x640xf32>
    %c24 = arith.constant 24 : index
    %c0_39 = arith.constant 0 : index
    %49 = vector.load %arg8[%c24, %c0_39] : memref<208x640xf32, #tpu.memory_space<vmem>>, vector<8x640xf32>
    tpu.vector_store %arg8[%c24, %c0_39], %48 {strides = array<i32>} : memref<208x640xf32, #tpu.memory_space<vmem>>, vector<8x640xf32>,
    %c0_40 = arith.constant 0 : index
    %c65 = arith.constant 65 : index
    %50 = vector.load %arg10[%c0_40, %c65] : memref<8x896xf32, #tpu.memory_space<vmem>>, vector<8x640xf32>
    %c32 = arith.constant 32 : index
    %c0_41 = arith.constant 0 : index
    %51 = vector.load %arg8[%c32, %c0_41] : memref<208x640xf32, #tpu.memory_space<vmem>>, vector<8x640xf32>
    tpu.vector_store %arg8[%c32, %c0_41], %50 {strides = array<i32>} : memref<208x640xf32, #tpu.memory_space<vmem>>, vector<8x640xf32>,
    %c0_42 = arith.constant 0 : index
    %c66 = arith.constant 66 : index
    %52 = vector.load %arg10[%c0_42, %c66] : memref<8x896xf32, #tpu.memory_space<vmem>>, vector<8x640xf32>
    %c40 = arith.constant 40 : index
    %c0_43 = arith.constant 0 : index
    %53 = vector.load %arg8[%c40, %c0_43] : memref<208x640xf32, #tpu.memory_space<vmem>>, vector<8x640xf32>
    tpu.vector_store %arg8[%c40, %c0_43], %52 {strides = array<i32>} : memref<208x640xf32, #tpu.memory_space<vmem>>, vector<8x640xf32>,
    %c0_44 = arith.constant 0 : index
    %c94 = arith.constant 94 : index
    %54 = vector.load %arg10[%c0_44, %c94] : memref<8x896xf32, #tpu.memory_space<vmem>>, vector<8x640xf32>
    %c48 = arith.constant 48 : index
    %c0_45 = arith.constant 0 : index
    %55 = vector.load %arg8[%c48, %c0_45] : memref<208x640xf32, #tpu.memory_space<vmem>>, vector<8x640xf32>
    tpu.vector_store %arg8[%c48, %c0_45], %54 {strides = array<i32>} : memref<208x640xf32, #tpu.memory_space<vmem>>, vector<8x640xf32>,
    %c0_46 = arith.constant 0 : index
    %c95_47 = arith.constant 95 : index
    %56 = vector.load %arg10[%c0_46, %c95_47] : memref<8x896xf32, #tpu.memory_space<vmem>>, vector<8x640xf32>
    %c56 = arith.constant 56 : index
    %c0_48 = arith.constant 0 : index
    %57 = vector.load %arg8[%c56, %c0_48] : memref<208x640xf32, #tpu.memory_space<vmem>>, vector<8x640xf32>
    tpu.vector_store %arg8[%c56, %c0_48], %56 {strides = array<i32>} : memref<208x640xf32, #tpu.memory_space<vmem>>, vector<8x640xf32>,
    %c0_49 = arith.constant 0 : index
    %c96_50 = arith.constant 96 : index
    %58 = vector.load %arg10[%c0_49, %c96_50] : memref<8x896xf32, #tpu.memory_space<vmem>>, vector<8x640xf32>
    %c64_51 = arith.constant 64 : index
    %c0_52 = arith.constant 0 : index
    %59 = vector.load %arg8[%c64_51, %c0_52] : memref<208x640xf32, #tpu.memory_space<vmem>>, vector<8x640xf32>
    tpu.vector_store %arg8[%c64_51, %c0_52], %58 {strides = array<i32>} : memref<208x640xf32, #tpu.memory_space<vmem>>, vector<8x640xf32>,
    %c0_53 = arith.constant 0 : index
    %c97_54 = arith.constant 97 : index
    %60 = vector.load %arg10[%c0_53, %c97_54] : memref<8x896xf32, #tpu.memory_space<vmem>>, vector<8x640xf32>
    %c72 = arith.constant 72 : index
    %c0_55 = arith.constant 0 : index
    %61 = vector.load %arg8[%c72, %c0_55] : memref<208x640xf32, #tpu.memory_space<vmem>>, vector<8x640xf32>
    tpu.vector_store %arg8[%c72, %c0_55], %60 {strides = array<i32>} : memref<208x640xf32, #tpu.memory_space<vmem>>, vector<8x640xf32>,
    %c0_56 = arith.constant 0 : index
    %c98 = arith.constant 98 : index
    %62 = vector.load %arg10[%c0_56, %c98] : memref<8x896xf32, #tpu.memory_space<vmem>>, vector<8x640xf32>
    %c80 = arith.constant 80 : index
    %c0_57 = arith.constant 0 : index
    %63 = vector.load %arg8[%c80, %c0_57] : memref<208x640xf32, #tpu.memory_space<vmem>>, vector<8x640xf32>
    tpu.vector_store %arg8[%c80, %c0_57], %62 {strides = array<i32>} : memref<208x640xf32, #tpu.memory_space<vmem>>, vector<8x640xf32>,
    %c0_58 = arith.constant 0 : index
    %c126 = arith.constant 126 : index
    %64 = vector.load %arg10[%c0_58, %c126] : memref<8x896xf32, #tpu.memory_space<vmem>>, vector<8x640xf32>
    %c88 = arith.constant 88 : index
    %c0_59 = arith.constant 0 : index
    %65 = vector.load %arg8[%c88, %c0_59] : memref<208x640xf32, #tpu.memory_space<vmem>>, vector<8x640xf32>
    tpu.vector_store %arg8[%c88, %c0_59], %64 {strides = array<i32>} : memref<208x640xf32, #tpu.memory_space<vmem>>, vector<8x640xf32>,
    %c0_60 = arith.constant 0 : index
    %c127_61 = arith.constant 127 : index
    %66 = vector.load %arg10[%c0_60, %c127_61] : memref<8x896xf32, #tpu.memory_space<vmem>>, vector<8x640xf32>
    %c96_62 = arith.constant 96 : index
    %c0_63 = arith.constant 0 : index
    %67 = vector.load %arg8[%c96_62, %c0_63] : memref<208x640xf32, #tpu.memory_space<vmem>>, vector<8x640xf32>
    tpu.vector_store %arg8[%c96_62, %c0_63], %66 {strides = array<i32>} : memref<208x640xf32, #tpu.memory_space<vmem>>, vector<8x640xf32>,
    %c0_64 = arith.constant 0 : index
    %c128_65 = arith.constant 128 : index
    %68 = vector.load %arg10[%c0_64, %c128_65] : memref<8x896xf32, #tpu.memory_space<vmem>>, vector<8x640xf32>
    %c104 = arith.constant 104 : index
    %c0_66 = arith.constant 0 : index
    %69 = vector.load %arg8[%c104, %c0_66] : memref<208x640xf32, #tpu.memory_space<vmem>>, vector<8x640xf32>
    tpu.vector_store %arg8[%c104, %c0_66], %68 {strides = array<i32>} : memref<208x640xf32, #tpu.memory_space<vmem>>, vector<8x640xf32>,
    %c0_67 = arith.constant 0 : index
    %c129_68 = arith.constant 129 : index
    %70 = vector.load %arg10[%c0_67, %c129_68] : memref<8x896xf32, #tpu.memory_space<vmem>>, vector<8x640xf32>
    %c112 = arith.constant 112 : index
    %c0_69 = arith.constant 0 : index
    %71 = vector.load %arg8[%c112, %c0_69] : memref<208x640xf32, #tpu.memory_space<vmem>>, vector<8x640xf32>
    tpu.vector_store %arg8[%c112, %c0_69], %70 {strides = array<i32>} : memref<208x640xf32, #tpu.memory_space<vmem>>, vector<8x640xf32>,
    %c0_70 = arith.constant 0 : index
    %c130 = arith.constant 130 : index
    %72 = vector.load %arg10[%c0_70, %c130] : memref<8x896xf32, #tpu.memory_space<vmem>>, vector<8x640xf32>
    %c120 = arith.constant 120 : index
    %c0_71 = arith.constant 0 : index
    %73 = vector.load %arg8[%c120, %c0_71] : memref<208x640xf32, #tpu.memory_space<vmem>>, vector<8x640xf32>
    tpu.vector_store %arg8[%c120, %c0_71], %72 {strides = array<i32>} : memref<208x640xf32, #tpu.memory_space<vmem>>, vector<8x640xf32>,
    %c0_72 = arith.constant 0 : index
    %c158 = arith.constant 158 : index
    %74 = vector.load %arg10[%c0_72, %c158] : memref<8x896xf32, #tpu.memory_space<vmem>>, vector<8x640xf32>
    %c128_73 = arith.constant 128 : index
    %c0_74 = arith.constant 0 : index
    %75 = vector.load %arg8[%c128_73, %c0_74] : memref<208x640xf32, #tpu.memory_space<vmem>>, vector<8x640xf32>
    tpu.vector_store %arg8[%c128_73, %c0_74], %74 {strides = array<i32>} : memref<208x640xf32, #tpu.memory_space<vmem>>, vector<8x640xf32>,
    %c0_75 = arith.constant 0 : index
    %c159_76 = arith.constant 159 : index
    %76 = vector.load %arg10[%c0_75, %c159_76] : memref<8x896xf32, #tpu.memory_space<vmem>>, vector<8x640xf32>
    %c136 = arith.constant 136 : index
    %c0_77 = arith.constant 0 : index
    %77 = vector.load %arg8[%c136, %c0_77] : memref<208x640xf32, #tpu.memory_space<vmem>>, vector<8x640xf32>
    tpu.vector_store %arg8[%c136, %c0_77], %76 {strides = array<i32>} : memref<208x640xf32, #tpu.memory_space<vmem>>, vector<8x640xf32>,
    %c0_78 = arith.constant 0 : index
    %c160_79 = arith.constant 160 : index
    %78 = vector.load %arg10[%c0_78, %c160_79] : memref<8x896xf32, #tpu.memory_space<vmem>>, vector<8x640xf32>
    %c144 = arith.constant 144 : index
    %c0_80 = arith.constant 0 : index
    %79 = vector.load %arg8[%c144, %c0_80] : memref<208x640xf32, #tpu.memory_space<vmem>>, vector<8x640xf32>
    tpu.vector_store %arg8[%c144, %c0_80], %78 {strides = array<i32>} : memref<208x640xf32, #tpu.memory_space<vmem>>, vector<8x640xf32>,
    %c0_81 = arith.constant 0 : index
    %c161_82 = arith.constant 161 : index
    %80 = vector.load %arg10[%c0_81, %c161_82] : memref<8x896xf32, #tpu.memory_space<vmem>>, vector<8x640xf32>
    %c152 = arith.constant 152 : index
    %c0_83 = arith.constant 0 : index
    %81 = vector.load %arg8[%c152, %c0_83] : memref<208x640xf32, #tpu.memory_space<vmem>>, vector<8x640xf32>
    tpu.vector_store %arg8[%c152, %c0_83], %80 {strides = array<i32>} : memref<208x640xf32, #tpu.memory_space<vmem>>, vector<8x640xf32>,
    %c0_84 = arith.constant 0 : index
    %c162 = arith.constant 162 : index
    %82 = vector.load %arg10[%c0_84, %c162] : memref<8x896xf32, #tpu.memory_space<vmem>>, vector<8x640xf32>
    %c160_85 = arith.constant 160 : index
    %c0_86 = arith.constant 0 : index
    %83 = vector.load %arg8[%c160_85, %c0_86] : memref<208x640xf32, #tpu.memory_space<vmem>>, vector<8x640xf32>
    tpu.vector_store %arg8[%c160_85, %c0_86], %82 {strides = array<i32>} : memref<208x640xf32, #tpu.memory_space<vmem>>, vector<8x640xf32>,
    %c0_87 = arith.constant 0 : index
    %c190 = arith.constant 190 : index
    %84 = vector.load %arg10[%c0_87, %c190] : memref<8x896xf32, #tpu.memory_space<vmem>>, vector<8x640xf32>
    %c168 = arith.constant 168 : index
    %c0_88 = arith.constant 0 : index
    %85 = vector.load %arg8[%c168, %c0_88] : memref<208x640xf32, #tpu.memory_space<vmem>>, vector<8x640xf32>
    tpu.vector_store %arg8[%c168, %c0_88], %84 {strides = array<i32>} : memref<208x640xf32, #tpu.memory_space<vmem>>, vector<8x640xf32>,
    %c0_89 = arith.constant 0 : index
    %c191 = arith.constant 191 : index
    %86 = vector.load %arg10[%c0_89, %c191] : memref<8x896xf32, #tpu.memory_space<vmem>>, vector<8x640xf32>
    %c176 = arith.constant 176 : index
    %c0_90 = arith.constant 0 : index
    %87 = vector.load %arg8[%c176, %c0_90] : memref<208x640xf32, #tpu.memory_space<vmem>>, vector<8x640xf32>
    tpu.vector_store %arg8[%c176, %c0_90], %86 {strides = array<i32>} : memref<208x640xf32, #tpu.memory_space<vmem>>, vector<8x640xf32>,
    %c0_91 = arith.constant 0 : index
    %c192 = arith.constant 192 : index
    %88 = vector.load %arg10[%c0_91, %c192] : memref<8x896xf32, #tpu.memory_space<vmem>>, vector<8x640xf32>
    %c184 = arith.constant 184 : index
    %c0_92 = arith.constant 0 : index
    %89 = vector.load %arg8[%c184, %c0_92] : memref<208x640xf32, #tpu.memory_space<vmem>>, vector<8x640xf32>
    tpu.vector_store %arg8[%c184, %c0_92], %88 {strides = array<i32>} : memref<208x640xf32, #tpu.memory_space<vmem>>, vector<8x640xf32>,
    %c0_93 = arith.constant 0 : index
    %c193 = arith.constant 193 : index
    %90 = vector.load %arg10[%c0_93, %c193] : memref<8x896xf32, #tpu.memory_space<vmem>>, vector<8x640xf32>
    %c192_94 = arith.constant 192 : index
    %c0_95 = arith.constant 0 : index
    %91 = vector.load %arg8[%c192_94, %c0_95] : memref<208x640xf32, #tpu.memory_space<vmem>>, vector<8x640xf32>
    tpu.vector_store %arg8[%c192_94, %c0_95], %90 {strides = array<i32>} : memref<208x640xf32, #tpu.memory_space<vmem>>, vector<8x640xf32>,
    %c0_96 = arith.constant 0 : index
    %c194 = arith.constant 194 : index
    %92 = vector.load %arg10[%c0_96, %c194] : memref<8x896xf32, #tpu.memory_space<vmem>>, vector<8x640xf32>
    %c200 = arith.constant 200 : index
    %c0_97 = arith.constant 0 : index
    %93 = vector.load %arg8[%c200, %c0_97] : memref<208x640xf32, #tpu.memory_space<vmem>>, vector<8x640xf32>
    tpu.vector_store %arg8[%c200, %c0_97], %92 {strides = array<i32>} : memref<208x640xf32, #tpu.memory_space<vmem>>, vector<8x640xf32>,
    %c0_98 = arith.constant 0 : index
    %c0_99 = arith.constant 0 : index
    %94 = vector.load %arg5[%c0_98, %c0_99] : memref<20x208xf32, #tpu.memory_space<vmem>>, vector<20x208xf32>
    %c0_100 = arith.constant 0 : index
    %c0_101 = arith.constant 0 : index
    %95 = vector.load %arg8[%c0_100, %c0_101] : memref<208x640xf32, #tpu.memory_space<vmem>>, vector<208x640xf32>
    %cst_102 = arith.constant dense<0.000000e+00> : vector<20x640xf32>
    %96 = tpu.matmul %94, %95, %cst_102 {dimension_numbers = #tpu.dot_dimension_numbers<[1], [0], [0], [1], [0, 0, 1, 1], [], []>} : vector<20x208xf32>, vector<208x640xf32>, vector<20x640xf32> -> vector<20x640xf32>
    %c0_103 = arith.constant 0 : index
    %c0_104 = arith.constant 0 : index
    %97 = vector.load %arg6[%c0_103, %c0_104] : memref<20x1xf32, #tpu.memory_space<vmem>>, vector<20x1xf32>
    %98 = vector.broadcast %97 : vector<20x1xf32> to vector<20x640xf32>
    %99 = arith.addf %96, %98 : vector<20x640xf32>
    %cst_105 = arith.constant 0.000000e+00 : f32
    %100 = vector.broadcast %cst_105 : f32 to vector<20x640xf32>
    %101 = arith.maximumf %99, %100 : vector<20x640xf32>
    %c0_106 = arith.constant 0 : index
    %c0_107 = arith.constant 0 : index
    %c0_108 = arith.constant 0 : index
    %102 = vector.load %arg7[%c0_106, %c0_107, %c0_108] : memref<1x20x640xf32, #tpu.memory_space<vmem>>, vector<1x20x640xf32>
    %103 = vector.shape_cast %102 : vector<1x20x640xf32> to vector<20x640xf32>
    %104 = vector.shape_cast %101 : vector<20x640xf32> to vector<1x20x640xf32>
    tpu.vector_store %arg7[%c0_106, %c0_107, %c0_108], %104 {strides = array<i32>} : memref<1x20x640xf32, #tpu.memory_space<vmem>>, vector<1x20x640xf32>,
    return
  }
  func.func @transform_0(%arg0: i32) -> (i32, i32, i32) {
    %c0_i32 = arith.constant 0 : i32
    %c0_i32_0 = arith.constant 0 : i32
    %c0_i32_1 = arith.constant 0 : i32
    return %arg0, %c0_i32, %c0_i32_0 : i32, i32, i32
  }
  func.func @transform_1(%arg0: i32) -> (i32, i32) {
    %c0_i32 = arith.constant 0 : i32
    %c0_i32_0 = arith.constant 0 : i32
    %c0_i32_1 = arith.constant 0 : i32
    return %c0_i32, %c0_i32_0 : i32, i32
  }
  func.func @transform_2(%arg0: i32) -> (i32, i32) {
    %c0_i32 = arith.constant 0 : i32
    %c0_i32_0 = arith.constant 0 : i32
    %c0_i32_1 = arith.constant 0 : i32
    return %c0_i32, %c0_i32_0 : i32, i32
  }
  func.func @transform_3(%arg0: i32) -> (i32, i32) {
    %c0_i32 = arith.constant 0 : i32
    %c0_i32_0 = arith.constant 0 : i32
    %c0_i32_1 = arith.constant 0 : i32
    return %c0_i32, %c0_i32_0 : i32, i32
  }
  func.func @transform_4(%arg0: i32) -> (i32, i32) {
    %c0_i32 = arith.constant 0 : i32
    %c0_i32_0 = arith.constant 0 : i32
    %c0_i32_1 = arith.constant 0 : i32
    return %c0_i32, %c0_i32_0 : i32, i32
  }
  func.func @transform_5(%arg0: i32) -> (i32, i32) {
    %c0_i32 = arith.constant 0 : i32
    %c0_i32_0 = arith.constant 0 : i32
    %c0_i32_1 = arith.constant 0 : i32
    return %c0_i32, %c0_i32_0 : i32, i32
  }
  func.func @transform_6(%arg0: i32) -> (i32, i32, i32) {
    %c0_i32 = arith.constant 0 : i32
    %c0_i32_0 = arith.constant 0 : i32
    %c0_i32_1 = arith.constant 0 : i32
    return %arg0, %c0_i32, %c0_i32_0 : i32, i32, i32
  }
}

</mosaic_0001>

<bundles_post_ra>
// kernel: tpu_custom_call.1
= control target key start
LH: loop header
LB: loop body
LE: loop exit
PB: predicated region body
PF: predicated region fallthrough
CT: control target
= control target key end

     0   :  { %11 = vsyncpa [#allocation6], 0  ;;  %s3815_s0 = inlined_call_operand.hbm [shape: f32[2,4,640], index: 0, kind: input, shape index: {}]   ;;  %s3816_s1 = inlined_call_operand.vmem [shape: f32[1,640], index: 1, kind: input, shape index: {}]   ;;  %s3817_s2 = inlined_call_operand.vmem [shape: f32[8,4], index: 2, kind: input, shape index: {}]   ;;  %s3818_s3 = inlined_call_operand.vmem [shape: f32[8,1], index: 3, kind: input, shape index: {}]   ;;  %s3819_s4 = inlined_call_operand.vmem [shape: f32[20,208], index: 4, kind: input, shape index: {}]   ;;  %s3820_s5 = inlined_call_operand.vmem [shape: f32[20,1], index: 5, kind: input, shape index: {}]   ;;  %s3821_s6 = inlined_call_operand.vmem [shape: f32[2,20,640], index: 6, kind: output, shape index: {}]  }
   0x1   :  { %13 = vsyncpa [#allocation6 + $0x1], 0  ;;  %s2630_s21 = smov 0   ;;  %s2632_s22 = smov 0  }
   0x2   :  { %s2634_s23 = smov 0   ;;  %s2636_s24 = smov 0  }
   0x3 LB: > { %s2649_s25 = sadd.s32 4294967295, %s2569_s24   ;;  %s2652_s26 = sadd.s32 1, %s2569_s24   ;;  %s2569_s24 = sphi %s2636_s24, %s3935_s24   ;;  %s2565_s23 = sphi %s2634_s23, %s3934_s23   ;;  %s2561_s22 = sphi %s2632_s22, %s3933_s22   ;;  %s2557_s21 = sphi %s2630_s21, %s3932_s21  }
   0x4   : > { %s23_s27 = ssub.s32 %s2569_s24, %s2652_s26  ;;  %s26_s28 = sadd.s32 1, %s2565_s23 }
   0x5   : > { %p24_p0 = scmp.eq.s32.totalorder %s23_s27, 0  ;;  %p33_p1 = scmp.ne.s32.totalorder %s2565_s23, %s2561_s22 }
   0x6   : > { %p34_p2 = scmp.eq.s32.totalorder %s2569_s24, 0  ;;  %p39_p3 = scmp.ne.s32.totalorder %s2561_s22, %s2557_s21 }
   0x7   : > { %s2662_s29 = scalar_select %p24_p0, %s2565_s23, %s26_s28  }
   0x8   : > { %p35_p4 = por %p34_p2, %p33_p1  ;;  %p40_p5 = scmp.eq.s32.totalorder %s2649_s25, 0 }
   0x9   : > { %p2447_p6 = scmp.lt.s32.totalorder %s2569_s24, 2  ;;  %s209_s7 = sand.u32 1, %s2565_s23  }
   0xa   : > { %p2666_p7 = por %p40_p5, %p39_p3  ;;  %s2437_s8 = smul.u32 20, %s209_s7 }
   0xb   : > { %s2438_s9 = smul.u32 320, %s2569_s24  ;;  %p2672_p8 = pnand %p2447_p6, %p35_p4 }
   0xc   : > { %s213_s14 = scalar_lea.vmem [#allocation5], %s2437_s8  ;;  %s210_s16 = scalar_lea.sflag [#allocation6], %s209_s7 }
   0xd   : > { %s2680_s13 = scalar_lea.hbm %s3815_s0, %s2438_s9  ;;  %s221_s15 = sshll.u32 %s213_s14, 4  ;;  %s2682_s15 = int_to_ptr.vmem [resolvable:$true] %s221_s15 }
   0xe   : > { %s2505_s17 = scalar_lea.hbm %s2680_s13, 320  ;;  %p2507_p11 = pneg %p2672_p8 }
   0xf   : > { %p2506_p10 = scmp.ne.s32.totalorder %s2680_s13, %s2505_s17  ;;  %s2510_s20 = scalar_lea.hbm %s3815_s0, 640 }
  0x10   : > { %p2511_p0 = scmp.lt.u32.totalorder %s2680_s13, %s3815_s0  ;;  %p2512_p1 = scmp.lt.u32.totalorder %s2510_s20, %s2505_s17 }
  0x11   : > { %p2508_p12 = pnand %p2507_p11, %p2506_p10  ;;  %p2514_p3 = scmp.lt.u32.totalorder %s2505_s17, %s2680_s13 }
  0x12   : > { %p2513_p2 = por %p2512_p1, %p2511_p0 }
  0x13   : > { %p2509_p13 = pneg %p2508_p12 }
  0x14   : > { %p2515_p4 = por %p2514_p3, %p2513_p2 }
  0x16   : > { %p2516_p5 = pnand %p2515_p4, %p2509_p13 }
  0x18   : > { %2519 = shalt.err (!%p2516_p5)
}
  0x19   : > { %s2520_s28 = scalar_lea.vmem %s2682_s15, 320  ;;  %s2571_s7 = smov [#allocation5]  }
  0x1a   : > { %p2521_p6 = scmp.ne.s32.totalorder %s2682_s15, %s2520_s28  ;;  %s2525_s8 = sshll.u32 %s2571_s7, 4  ;;  %s2526_s8 = int_to_ptr.vmem [resolvable:$false] %s2525_s8 }
  0x1b   : > { %s2527_s9 = scalar_lea.vmem %s2526_s8, 640  ;;  %p2528_p9 = scmp.lt.s32.totalorder %s2682_s15, %s2526_s8 }
  0x1c   : > { %p2523_p10 = pnand %p2521_p6, %p2507_p11  ;;  %p2529_p0 = scmp.lt.s32.totalorder %s2527_s9, %s2520_s28 }
  0x1e   : > { %p2524_p12 = pneg %p2523_p10  ;;  %p2530_p1 = por %p2529_p0, %p2528_p9 }
  0x20   : > { %p2531_p2 = pnand %p2530_p1, %p2524_p12 }
  0x22   : > { %2534 = shalt.err (!%p2531_p2)
}
  0x23   : > { %2446 = dma.hbm_to_vmem [thread:$0]  (!%p2672_p8), %s2680_s13, 320, %s2682_s15, %s210_s16  }
  0x24   : > { %p226_p13 = scmp.lt.s32.totalorder %s2569_s24, 3  ;;  %p3848_p3 = scmp.ge.s32.totalorder %s2569_s24, 1 }
  0x26   : > { %p227_p11 = pnand %p3848_p3, %p226_p13 }
  0x28   : > { %230 = sbr.rel (%p227_p11) target bundleno = 892 (0x37c), region = 44 }
  0x2f   : > { %s232_s11 = sand.u32 1, %s2561_s22  }
  0x30   : > { %s2439_s12 = smul.u32 20, %s232_s11  ;;  %s233_s14 = scalar_lea.sflag [#allocation6], %s232_s11 }
  0x32   : > { %s236_s17 = scalar_lea.vmem [#allocation5], %s2439_s12 }
  0x33   : > { %2552 = dma.done.wait (%p2666_p7), %s233_s14, 320  }
  0x34   : > { %2554 = vsyncadd (%p2666_p7), %s233_s14, 4294966976  ;;  %v275_v0 = vlaneseq  ;;  %v3825_v1 = vmov 0.0   ;;  %v2573_v3 = vmov 0   ;;  %v2721_v9 = vld [vmem:[%s236_s17] sm:$0xff]  ;;  %v2726_v11 = vld [vmem:[%s236_s17 + $0x8] sm:$0xff]  ;;  %vm335_vm0 = vcmask 1043456  }
  0x35   : > { %603 = vmatprep.mubr.f32.mxu0 %v3825_v1  ;;  %303 = vst [vmem:[#allocation3] sm:$0xf] %v3825_v1  ;;  %304 = vst [vmem:[#allocation3 + $0x18] sm:$0xf] %v3825_v1  ;;  %674 = vmatprep.mubr.f32.mxu1 %v3825_v1  ;;  %v273_v10 = vld [vmem:[%s3816_s1] sm:$0x1f] }
  0x36   : > { %v276_v2 = vshrl.u32 %v275_v0, 7  ;;  %2503 = vset.pattern.permute.xlu0 %v2573_v3  ;;  %2504 = vset.pattern.permute.xlu1 %v2573_v3  ;;  %305 = vst [vmem:[#allocation3 + $0x4] sm:$0xff] %v2721_v9  ;;  %306 = vst [vmem:[#allocation3 + $0xc] sm:$0xff] %v2726_v11  ;;  %v2738_v16 = vld [vmem:[%s236_s17 + $0x10] sm:$0xf]  ;;  %v519_v17 = vld [vmem:[%s3818_s3] sm:$0xff] }
  0x37   : > { %307 = vst [vmem:[#allocation3 + $0x14] sm:$0xf] %v2738_v16  ;;  %522 = vperm.xlu0 %2503, %v519_v17   ;;  %v518_v26 = vld [vmem:[%s3817_s2] sm:$0xff]  ;;  %vm525_vm1 = vcmask 31744   ;;  %vm2574_vm2 = vmmov 0   ;;  %s2575_s18 = smov 33  }
  0x38   : > { %v277_v4 = vsub.s32 0, %v276_v2  ;;  %v281_v5 = vsub.s32 1, %v276_v2  ;;  %v285_v6 = vsub.s32 2, %v276_v2  ;;  %v289_v7 = vsub.s32 3, %v276_v2  ;;  %s2576_s19 = smov 32   ;;  %s2577_s20 = smov 31  }
  0x39   : > { %v293_v8 = vsub.s32 4, %v276_v2  ;;  %s2578_s21 = smov 1   ;;  %s2579_s27 = smov 127   ;;  %vm3824_vm3 = vcmask 269312   ;;  %vm358_vm4 = vcmask 261120   ;;  %vm3840_vm5 = vcmask 252928  }
  0x3a   : > { %v2728_v12 = vrot.slane %v273_v10, %v277_v4  ;;  %v2730_v13 = vrot.slane %v273_v10, %v281_v5  ;;  %v2733_v14 = vrot.slane %v273_v10, %v285_v6  ;;  %v2735_v15 = vrot.slane %v273_v10, %v289_v7  ;;  %s2580_s28 = smov 97   ;;  %s3823_s7 = smov 96  }
  0x3b   : > { %v2743_v18 = vrot.slane %v273_v10, %v293_v8  ;;  %s2582_s8 = smov 95   ;;  %s2583_s9 = smov 66   ;;  %vm400_vm6 = vcmask 7168   ;;  %vm427_vm7 = vcmask 1039360   ;;  %vm448_vm8 = vcmask 793600  }
  0x3c   : > { %v2748_v19 = vcombine.low %v2728_v12, %v2730_v13  ;;  %v2752_v20 = vcombine.low %v2733_v14, %v2735_v15  ;;  %s2584_s11 = smov 65   ;;  %s2585_s12 = smov 64   ;;  %vm469_vm9 = vcmask 785408   ;;  %vm490_vm10 = vcmask 777216  }
  0x3d   : > { %v302_v21 = vmul.f32 %v2743_v18, %v2738_v16  ;;  %v321_v27 = vld [vmem:[#allocation3 + $0x8] sm:$0xff]  ;;  %v320_v28 = vld [vmem:[#allocation3] sm:$0xff]  ;;  %s2586_s14 = smov 63   ;;  %s2587_s17 = smov 62   ;;  %vm796_vm11 = vcmask 539648   ;;  %vm836_vm12 = vcmask 531456  }
  0x3e   : > { %v300_v22 = vmul.f32 %v2748_v19, %v2721_v9  ;;  %v301_v23 = vmul.f32 %v2752_v20, %v2726_v11  ;;  %328 = vrot.lane.b32.xlu1 %v321_v27, %s2575_s18  ;;  %326 = vrot.lane.b32.xlu0 %v320_v28, %s2575_s18  ;;  %v322_v29 = vld [vmem:[#allocation3 + $0x10] sm:$0xff]  ;;  %s2588_s24 = smov 34   ;;  %s2589_s30 = smov 30   ;;  %vm876_vm13 = vcmask 523264   ;;  %vm916_vm14 = vcmask 515072  }
  0x3f   : > { %319 = vst [vmem:[#allocation2 + $0x20] sm:$0xf] %v302_v21  ;;  %v413_v30 = vld [vmem:[#allocation3 + $0x14] sm:$0xff]  ;;  %s2590_s10 = smov 2   ;;  %s2591_s13 = smov 98   ;;  %vm956_vm15 = vcmask 506880  }
  0x40   : > { %v311_v24 = vcombine.high %v300_v22, %v300_v22  ;;  %315 = vst [vmem:[#allocation2] sm:$0xf] %v300_v22  ;;  %v312_v25 = vcombine.high %v301_v23, %v301_v23  ;;  %317 = vst [vmem:[#allocation2 + $0x10] sm:$0xf] %v301_v23  ;;  %s3822_s15 = smov 94   ;;  %s2593_s16 = smov 126  }
  0x41   : > { %p265_p7 = scmp.lt.s32.totalorder %s2649_s25, 1 }
  0x42   : > { %316 = vst [vmem:[#allocation2 + $0x8] sm:$0xf] %v311_v24  ;;  %2242 = vmatprep.subr.msk.mxu0 %vm335_vm0, %v311_v24  ;;  %318 = vst [vmem:[#allocation2 + $0x18] sm:$0xf] %v312_v25  ;;  %2245 = vmatprep.subr.msk.mxu1 %vm335_vm0, %v312_v25 }
  0x43   : > { %2243 = vmatpush1.msk.msra.mxu0 %vm335_vm0, %v300_v22  ;;  %2246 = vmatpush1.msk.msra.mxu1 %vm335_vm0, %v301_v23  ;;  %s3937_s25 = smov (!%p265_p7, %s2649_s25), 1 }
  0x44   : > { %2244 = vmatmul.mubr.msk.f32.vlgmr.msra.gmra.mrb[0].mxu0 %vm525_vm1, %v518_v26  ;;  %2247 = vmatmul.mubr.msk.f32.vlgmr.msra.gmra.mrb[0].mxu1 %vm525_vm1, %v518_v26 }
  0x45   : > { %2263 = vmatprep.subr.mxu0 %v3825_v1  ;;  %2265 = vmatprep.mubr.msk.f32.mxu0 %vm2574_vm2, %v3825_v1  ;;  %vm3838_vm2 = vcmask 15360  }
  0x46   : > { %2264 = vmatpush3.msk.msra.mxu0 %vm335_vm0, %v302_v21  ;;  %348 = vrot.lane.b32.xlu1 %v320_v28, %s2576_s19 }
  0x47   : > { %350 = vrot.lane.b32.xlu0 %v321_v27, %s2576_s19 }
  0x48   : > { %2266 = vmatmul.mubr.msk.f32.vlgmr.msra.gmra.mrb[2].mxu0 %vm525_vm1, %v518_v26  ;;  %vm1153_vm1 = vcmask 244736  }
  0x4a   : > { %330 = vrot.lane.b32.xlu1 %v322_v29, %s2575_s18 }
  0x4b   : > { %369 = vrot.lane.b32.xlu0 %v320_v28, %s2577_s20 }
  0x4e   : > { %371 = vrot.lane.b32.xlu1 %v321_v27, %s2577_s20 }
  0x4f   : > { %352 = vrot.lane.b32.xlu0 %v322_v29, %s2576_s19 }
  0x52   : > { %390 = vrot.lane.b32.xlu1 %v320_v28, %s2578_s21 }
  0x53   : > { %392 = vrot.lane.b32.xlu0 %v321_v27, %s2578_s21 }
  0x56   : > { %373 = vrot.lane.b32.xlu1 %v322_v29, %s2577_s20 }
  0x57   : > { %417 = vrot.lane.b32.xlu0 %v2721_v9, %s2579_s27 }
  0x5a   : > { %419 = vrot.lane.b32.xlu1 %v2726_v11, %s2579_s27 }
  0x5b   : > { %394 = vrot.lane.b32.xlu0 %v322_v29, %s2578_s21 }
  0x5e   : > { %438 = vrot.lane.b32.xlu1 %v2721_v9, %s2580_s28 }
  0x5f   : > { %440 = vrot.lane.b32.xlu0 %v2726_v11, %s2580_s28 }
  0x62   : > { %421 = vrot.lane.b32.xlu1 %v413_v30, %s2579_s27 }
  0x63   : > { %459 = vrot.lane.b32.xlu0 %v2721_v9, %s3823_s7 }
  0x66   : > { %461 = vrot.lane.b32.xlu1 %v2726_v11, %s3823_s7 }
  0x67   : > { %442 = vrot.lane.b32.xlu0 %v413_v30, %s2580_s28 }
  0x6a   : > { %480 = vrot.lane.b32.xlu1 %v2721_v9, %s2582_s8 }
  0x6b   : > { %482 = vrot.lane.b32.xlu0 %v2726_v11, %s2582_s8 }
  0x6e   : > { %463 = vrot.lane.b32.xlu1 %v413_v30, %s3823_s7 }
  0x6f   : > { %484 = vrot.lane.b32.xlu0 %v413_v30, %s2582_s8 }
  0x72   : > { %784 = vrot.lane.b32.xlu1 %v3825_v1, %s2583_s9 }
  0x73   : > { %824 = vrot.lane.b32.xlu0 %v3825_v1, %s2584_s11 }
  0x76   : > { %864 = vrot.lane.b32.xlu1 %v3825_v1, %s2585_s12 }
  0x77   : > { %904 = vrot.lane.b32.xlu0 %v3825_v1, %s2586_s14 }
  0x7a   : > { %944 = vrot.lane.b32.xlu1 %v3825_v1, %s2587_s17 }
  0x7b   : > { %984 = vrot.lane.b32.xlu0 %v3825_v1, %s2588_s24 }
  0x7e   : > { %1024 = vrot.lane.b32.xlu1 %v3825_v1, %s2575_s18 }
  0x7f   : > { %1063 = vrot.lane.b32.xlu0 %v3825_v1, %s2576_s19 }
  0x82   : > { %1102 = vrot.lane.b32.xlu1 %v3825_v1, %s2577_s20 }
  0x83   : > { %1141 = vrot.lane.b32.xlu0 %v3825_v1, %s2589_s30 }
  0x86   : > { %1181 = vrot.lane.b32.xlu1 %v3825_v1, %s2590_s10 }
  0x87   : > { %1221 = vrot.lane.b32.xlu0 %v3825_v1, %s2578_s21 }
  0xb0   : > { %v329_v31 = vpop.permute.xlu1 %328 }
  0xb1   : > { %v333_v39 = vrot.slane %v329_v31, 4 }
  0xb6   : > { %v2829_v32 = vpop.permute.xlu0 %522 }
  0xb8   : > { %v349_v33 = vpop.permute.xlu1 %348 }
  0xb9   : > { %v354_v42 = vrot.slane %v349_v33, 4 }
  0xba   : > { %v327_v34 = vpop.permute.xlu0 %326 }
  0xbb   : > { %v332_v37 = vrot.slane %v327_v34, 4 }
  0xbc   : > { %v331_v35 = vpop.permute.xlu1 %330 }
  0xbd   : > { %v336_v41 = vsel %vm335_vm0, %v332_v37, %v333_v39  ;;  %v334_v43 = vrot.slane %v331_v35, 4 }
  0xbe   : > { %v351_v36 = vpop.permute.xlu0 %350  ;;  %v338_v47 = vsel %vm3824_vm3, %v327_v34, %v336_v41 }
  0xbf   : > { %v355_v45 = vrot.slane %v351_v36, 4  ;;  %v339_v49 = vsel %vm335_vm0, %v333_v39, %v334_v43  ;;  %v345_v53 = vmax.f32 %v2721_v9, %v338_v47  ;;  %v341_v58 = vsel %vm3824_vm3, %v331_v35, %v334_v43 }
  0xc0   : > { %v372_v38 = vpop.permute.xlu1 %371  ;;  %v340_v57 = vsel %vm3824_vm3, %v329_v31, %v339_v49  ;;  %v347_v3 = vmax.f32 %v2738_v16, %v341_v58 }
  0xc1   : > { %v357_v48 = vsel %vm335_vm0, %v354_v42, %v355_v45  ;;  %v376_v54 = vrot.slane %v372_v38, 4  ;;  %v346_v2 = vmax.f32 %v2726_v11, %v340_v57 }
  0xc2   : > { %v370_v40 = vpop.permute.xlu0 %369  ;;  %v359_v56 = vsel %vm358_vm4, %v349_v33, %v357_v48 }
  0xc3   : > { %v375_v50 = vrot.slane %v370_v40, 4  ;;  %v366_v0 = vmax.f32 %v345_v53, %v359_v56 }
  0xc4   : > { %v391_v44 = vpop.permute.xlu1 %390 }
  0xc5   : > { %v378_v59 = vsel %vm335_vm0, %v375_v50, %v376_v54  ;;  %v396_v61 = vrot.slane %v391_v44, 4 }
  0xc6   : > { %v353_v46 = vpop.permute.xlu0 %352  ;;  %v380_v6 = vsel %vm3840_vm5, %v370_v40, %v378_v59 }
  0xc7   : > { %v356_v51 = vrot.slane %v353_v46, 4  ;;  %v387_v22 = vmax.f32 %v366_v0, %v380_v6 }
  0xc8   : > { %v374_v52 = vpop.permute.xlu1 %373 }
  0xc9   : > { %v360_v60 = vsel %vm335_vm0, %v355_v45, %v356_v51  ;;  %v377_v62 = vrot.slane %v374_v52, 4  ;;  %v362_v8 = vsel %vm358_vm4, %v353_v46, %v356_v51 }
  0xca   : > { %v393_v55 = vpop.permute.xlu0 %392  ;;  %v361_v7 = vsel %vm358_vm4, %v351_v36, %v360_v60  ;;  %v368_v11 = vmax.f32 %v347_v3, %v362_v8 }
  0xcb   : > { %v397_v4 = vrot.slane %v393_v55, 4  ;;  %v381_v10 = vsel %vm335_vm0, %v376_v54, %v377_v62  ;;  %v367_v23 = vmax.f32 %v346_v2, %v361_v7  ;;  %v383_v27 = vsel %vm3840_vm5, %v374_v52, %v377_v62 }
  0xcc   : > { %v420_v63 = vpop.permute.xlu1 %419  ;;  %v382_v26 = vsel %vm3840_vm5, %v372_v38, %v381_v10  ;;  %v389_v37 = vmax.f32 %v368_v11, %v383_v27 }
  0xcd   : > { %v399_v9 = vsel %vm335_vm0, %v396_v61, %v397_v4  ;;  %v424_v24 = vrot.slane %v420_v63, 4  ;;  %v388_v36 = vmax.f32 %v367_v23, %v382_v26 }
  0xce   : > { %v418_v5 = vpop.permute.xlu0 %417  ;;  %v401_v25 = vsel %vm400_vm6, %v391_v44, %v399_v9 }
  0xcf   : > { %v423_v17 = vrot.slane %v418_v5, 4  ;;  %v408_v35 = vmax.f32 %v387_v22, %v401_v25 }
  0xd0   : > { %v439_v21 = vpop.permute.xlu1 %438 }
  0xd1   : > { %v426_v29 = vsel %vm335_vm0, %v423_v17, %v424_v24  ;;  %v444_v33 = vrot.slane %v439_v21, 4 }
  0xd2   : > { %v395_v16 = vpop.permute.xlu0 %394  ;;  %v428_v40 = vsel %vm427_vm7, %v418_v5, %v426_v29 }
  0xd3   : > { %v398_v28 = vrot.slane %v395_v16, 4  ;;  %v435_v46 = vmax.f32 %v408_v35, %v428_v40 }
  0xd4   : > { %v422_v30 = vpop.permute.xlu1 %421 }
  0xd5   : > { %v402_v31 = vsel %vm335_vm0, %v397_v4, %v398_v28  ;;  %v425_v34 = vrot.slane %v422_v30, 4  ;;  %v404_v38 = vsel %vm400_vm6, %v395_v16, %v398_v28 }
  0xd6   : > { %v441_v39 = vpop.permute.xlu0 %440  ;;  %v403_v41 = vsel %vm400_vm6, %v393_v55, %v402_v31  ;;  %v410_v48 = vmax.f32 %v389_v37, %v404_v38 }
  0xd7   : > { %v445_v42 = vrot.slane %v441_v39, 4  ;;  %v429_v45 = vsel %vm335_vm0, %v424_v24, %v425_v34  ;;  %v409_v47 = vmax.f32 %v388_v36, %v403_v41  ;;  %v431_v51 = vsel %vm427_vm7, %v422_v30, %v425_v34 }
  0xd8   : > { %v462_v43 = vpop.permute.xlu1 %461  ;;  %v430_v54 = vsel %vm427_vm7, %v420_v63, %v429_v45  ;;  %v437_v58 = vmax.f32 %v410_v48, %v431_v51 }
  0xd9   : > { %v447_v44 = vsel %vm335_vm0, %v444_v33, %v445_v42  ;;  %v466_v53 = vrot.slane %v462_v43, 4  ;;  %v436_v60 = vmax.f32 %v409_v47, %v430_v54 }
  0xda   : > { %v460_v49 = vpop.permute.xlu0 %459  ;;  %v449_v50 = vsel %vm448_vm8, %v439_v21, %v447_v44 }
  0xdb   : > { %v465_v52 = vrot.slane %v460_v49, 4  ;;  %v456_v57 = vmax.f32 %v435_v46, %v449_v50 }
  0xdc   : > { %v481_v55 = vpop.permute.xlu1 %480 }
  0xdd   : > { %v468_v56 = vsel %vm335_vm0, %v465_v52, %v466_v53  ;;  %v486_v4 = vrot.slane %v481_v55, 4 }
  0xde   : > { %v443_v59 = vpop.permute.xlu0 %442  ;;  %v470_v61 = vsel %vm469_vm9, %v460_v49, %v468_v56 }
  0xdf   : > { %v446_v62 = vrot.slane %v443_v59, 4  ;;  %v477_v6 = vmax.f32 %v456_v57, %v470_v61 }
  0xe0   : > { %v464_v0 = vpop.permute.xlu1 %463 }
  0xe1   : > { %v450_v2 = vsel %vm335_vm0, %v445_v42, %v446_v62  ;;  %v452_v3 = vsel %vm448_vm8, %v443_v59, %v446_v62  ;;  %v467_v5 = vrot.slane %v464_v0, 4 }
  0xe2   : > { %v451_v63 = vsel %vm448_vm8, %v441_v39, %v450_v2  ;;  %v458_v7 = vmax.f32 %v437_v58, %v452_v3  ;;  %v483_v8 = vpop.permute.xlu0 %482 }
  0xe3   : > { %v457_v9 = vmax.f32 %v436_v60, %v451_v63  ;;  %v487_v10 = vrot.slane %v483_v8, 4  ;;  %v471_v17 = vsel %vm335_vm0, %v466_v53, %v467_v5  ;;  %v473_v21 = vsel %vm469_vm9, %v464_v0, %v467_v5 }
  0xe4   : > { %v472_v22 = vsel %vm469_vm9, %v462_v43, %v471_v17  ;;  %v479_v24 = vmax.f32 %v458_v7, %v473_v21 }
  0xe5   : > { %v489_v23 = vsel %vm335_vm0, %v486_v4, %v487_v10  ;;  %v478_v26 = vmax.f32 %v457_v9, %v472_v22 }
  0xe6   : > { %v491_v11 = vsel %vm490_vm10, %v481_v55, %v489_v23  ;;  %v485_v16 = vpop.permute.xlu0 %484 }
  0xe7   : > { %v498_v25 = vmax.f32 %v477_v6, %v491_v11  ;;  %v488_v27 = vrot.slane %v485_v16, 4 }
  0xe9   : > { %v501_v28 = vmul.f32 %v498_v25, %v2748_v19  ;;  %v492_v29 = vsel %vm335_vm0, %v487_v10, %v488_v27  ;;  %v494_v30 = vsel %vm490_vm10, %v485_v16, %v488_v27  ;;  %vm996_vm0 = vcmask 277504  }
  0xea   : > { %v493_v31 = vsel %vm490_vm10, %v483_v8, %v492_v29  ;;  %v500_v33 = vmax.f32 %v479_v24, %v494_v30 }
  0xeb   : > { %v507_v34 = vcombine.low %v501_v28, %v501_v28  ;;  %514 = vst [vmem:[#allocation2 + $0x8] sm:$0xf0] %v501_v28  ;;  %v499_v35 = vmax.f32 %v478_v26, %v493_v31 }
  0xec   : > { %v503_v36 = vmul.f32 %v500_v33, %v2743_v18 }
  0xed   : > { %513 = vst [vmem:[#allocation2] sm:$0xf0] %v507_v34  ;;  %v502_v37 = vmul.f32 %v499_v35, %v2752_v20 }
  0xee   : > { %v509_v39 = vcombine.low %v503_v36, %v503_v36 }
  0xef   : > { %v508_v40 = vcombine.low %v502_v37, %v502_v37  ;;  %516 = vst [vmem:[#allocation2 + $0x18] sm:$0xf0] %v502_v37 }
  0xf0   : > { %517 = vst [vmem:[#allocation2 + $0x20] sm:$0xf0] %v509_v39 }
  0xf1   : > { %515 = vst [vmem:[#allocation2 + $0x10] sm:$0xf0] %v508_v40 }
  0xf6   : > { %v1738_v30 = vld [vmem:[#allocation2 + $0x18] sm:$0xff] }
 0x117   : > { %v605_v19 = vpop.f32.mrb[0].mxu0  ;;  %v676_v41 = vpop.f32.mrb[0].mxu1 }
 0x118   : > { %v606_v38 = vadd.f32 %v605_v19, %v2829_v32  ;;  %v677_v42 = vadd.f32 %v676_v41, %v2829_v32  ;;  %v607_v43 = vpop.f32.mrb[1].mxu0  ;;  %v678_v44 = vpop.f32.mrb[1].mxu1 }
 0x119   : > { %v608_v45 = vadd.f32 %v607_v43, %v2829_v32  ;;  %v679_v46 = vadd.f32 %v678_v44, %v2829_v32 }
 0x11a   : > { %v751_v47 = vmax.f32 %v606_v38, 0.0  ;;  %v753_v48 = vmax.f32 %v677_v42, 0.0 }
 0x11b   : > { %v752_v20 = vmax.f32 %v608_v45, 0.0  ;;  %v754_v49 = vmax.f32 %v679_v46, 0.0  ;;  %v747_v50 = vpop.f32.mrb[2].mxu0 }
 0x11c   : > { %v2882_v51 = vmul.f32 %v751_v47, %v2728_v12  ;;  %v2885_v52 = vmul.f32 %v753_v48, %v2733_v14  ;;  %v748_v53 = vadd.f32 %v747_v50, %v2829_v32  ;;  %v2267_v54 = vpop.f32.mrb[3].mxu0  ;;  %v825_v14 = vpop.permute.xlu0 %824 }
 0x11d   : > { %v2889_v55 = vmul.f32 %v752_v20, %v2730_v13  ;;  %v2892_v56 = vmul.f32 %v754_v49, %v2735_v15  ;;  %v785_v13 = vpop.permute.xlu1 %784 }
 0x11e   : > { %1253 = vst [vmem:[#allocation2 + $0x208] sm:$0xff] %v2882_v51  ;;  %1255 = vst [vmem:[#allocation2 + $0x218] sm:$0xff] %v2885_v52  ;;  %v755_v57 = vmax.f32 %v748_v53, 0.0  ;;  %790 = vrot.lane.b32.xlu0 %v2885_v52, %s2583_s9  ;;  %786 = vrot.lane.b32.xlu1 %v2882_v51, %s2583_s9 }
 0x11f   : > { %1254 = vst [vmem:[#allocation2 + $0x210] sm:$0xff] %v2889_v55  ;;  %1256 = vst [vmem:[#allocation2 + $0x220] sm:$0xff] %v2892_v56 }
 0x120   : > { %v2903_v12 = vmul.f32 %v755_v57, %v2743_v18  ;;  %v905_v18 = vpop.permute.xlu0 %904 }
 0x121   : > { %v865_v15 = vpop.permute.xlu1 %864 }
 0x122   : > { %1257 = vst [vmem:[#allocation2 + $0x228] sm:$0xff] %v2903_v12  ;;  %826 = vrot.lane.b32.xlu0 %v2882_v51, %s2584_s11  ;;  %1227 = vrot.lane.b32.xlu1 %v2885_v52, %s2578_s21 }
 0x124   : > { %v2994_v58 = vpop.permute.xlu0 %984 }
 0x125   : > { %v945_v32 = vpop.permute.xlu1 %944 }
 0x126   : > { %866 = vrot.lane.b32.xlu0 %v2882_v51, %s2585_s12  ;;  %1270 = vrot.lane.b32.xlu1 %v2882_v51, %s2579_s27 }
 0x128   : > { %v3006_v60 = vpop.permute.xlu0 %1063 }
 0x129   : > { %v3004_v59 = vpop.permute.xlu1 %1024 }
 0x12a   : > { %830 = vrot.lane.b32.xlu0 %v2885_v52, %s2584_s11  ;;  %1349 = vrot.lane.b32.xlu1 %v2882_v51, %s2591_s13 }
 0x12c   : > { %v3014_v62 = vpop.permute.xlu0 %1141 }
 0x12d   : > { %v3012_v61 = vpop.permute.xlu1 %1102 }
 0x12e   : > { %870 = vrot.lane.b32.xlu0 %v2885_v52, %s2585_s12  ;;  %1428 = vrot.lane.b32.xlu1 %v2882_v51, %s3823_s7 }
 0x130   : > { %v3026_v2 = vpop.permute.xlu0 %1221 }
 0x131   : > { %v3024_v0 = vpop.permute.xlu1 %1181 }
 0x132   : > { %906 = vrot.lane.b32.xlu0 %v2882_v51, %s2586_s14  ;;  %1506 = vrot.lane.b32.xlu1 %v2882_v51, %s3822_s15 }
 0x136   : > { %946 = vrot.lane.b32.xlu0 %v2882_v51, %s2587_s17  ;;  %792 = vrot.lane.b32.xlu1 %v2892_v56, %s2583_s9 }
 0x13a   : > { %910 = vrot.lane.b32.xlu0 %v2885_v52, %s2586_s14  ;;  %828 = vrot.lane.b32.xlu1 %v2889_v55, %s2584_s11 }
 0x13e   : > { %950 = vrot.lane.b32.xlu0 %v2885_v52, %s2587_s17  ;;  %868 = vrot.lane.b32.xlu1 %v2889_v55, %s2585_s12 }
 0x142   : > { %986 = vrot.lane.b32.xlu0 %v2882_v51, %s2588_s24  ;;  %832 = vrot.lane.b32.xlu1 %v2892_v56, %s2584_s11 }
 0x146   : > { %1026 = vrot.lane.b32.xlu0 %v2882_v51, %s2575_s18  ;;  %872 = vrot.lane.b32.xlu1 %v2892_v56, %s2585_s12 }
 0x14a   : > { %990 = vrot.lane.b32.xlu0 %v2885_v52, %s2588_s24  ;;  %908 = vrot.lane.b32.xlu1 %v2889_v55, %s2586_s14 }
 0x14e   : > { %1030 = vrot.lane.b32.xlu0 %v2885_v52, %s2575_s18  ;;  %948 = vrot.lane.b32.xlu1 %v2889_v55, %s2587_s17 }
 0x152   : > { %1065 = vrot.lane.b32.xlu0 %v2882_v51, %s2576_s19  ;;  %912 = vrot.lane.b32.xlu1 %v2892_v56, %s2586_s14 }
 0x156   : > { %1104 = vrot.lane.b32.xlu0 %v2882_v51, %s2577_s20  ;;  %952 = vrot.lane.b32.xlu1 %v2892_v56, %s2587_s17 }
 0x15a   : > { %1069 = vrot.lane.b32.xlu0 %v2885_v52, %s2576_s19  ;;  %988 = vrot.lane.b32.xlu1 %v2889_v55, %s2588_s24 }
 0x15e   : > { %1108 = vrot.lane.b32.xlu0 %v2885_v52, %s2577_s20  ;;  %1028 = vrot.lane.b32.xlu1 %v2889_v55, %s2575_s18 }
 0x162   : > { %1143 = vrot.lane.b32.xlu0 %v2882_v51, %s2589_s30  ;;  %992 = vrot.lane.b32.xlu1 %v2892_v56, %s2588_s24 }
 0x166   : > { %1183 = vrot.lane.b32.xlu0 %v2882_v51, %s2590_s10  ;;  %1032 = vrot.lane.b32.xlu1 %v2892_v56, %s2575_s18 }
 0x16a   : > { %1147 = vrot.lane.b32.xlu0 %v2885_v52, %s2589_s30  ;;  %1067 = vrot.lane.b32.xlu1 %v2889_v55, %s2576_s19 }
 0x16e   : > { %1187 = vrot.lane.b32.xlu0 %v2885_v52, %s2590_s10  ;;  %1106 = vrot.lane.b32.xlu1 %v2889_v55, %s2577_s20 }
 0x172   : > { %1223 = vrot.lane.b32.xlu0 %v2882_v51, %s2578_s21  ;;  %1071 = vrot.lane.b32.xlu1 %v2892_v56, %s2576_s19 }
 0x176   : > { %1274 = vrot.lane.b32.xlu0 %v2885_v52, %s2579_s27  ;;  %1110 = vrot.lane.b32.xlu1 %v2892_v56, %s2577_s20 }
 0x17a   : > { %1313 = vrot.lane.b32.xlu0 %v2885_v52, %s2593_s16  ;;  %1145 = vrot.lane.b32.xlu1 %v2889_v55, %s2589_s30 }
 0x17e   : > { %1309 = vrot.lane.b32.xlu0 %v2882_v51, %s2593_s16  ;;  %1185 = vrot.lane.b32.xlu1 %v2889_v55, %s2590_s10 }
 0x182   : > { %1353 = vrot.lane.b32.xlu0 %v2885_v52, %s2591_s13  ;;  %1149 = vrot.lane.b32.xlu1 %v2892_v56, %s2589_s30 }
 0x186   : > { %1393 = vrot.lane.b32.xlu0 %v2885_v52, %s2580_s28  ;;  %1189 = vrot.lane.b32.xlu1 %v2892_v56, %s2590_s10 }
 0x18a   : > { %1389 = vrot.lane.b32.xlu0 %v2882_v51, %s2580_s28  ;;  %1225 = vrot.lane.b32.xlu1 %v2889_v55, %s2578_s21 }
 0x18e   : > { %1432 = vrot.lane.b32.xlu0 %v2885_v52, %s3823_s7  ;;  %1272 = vrot.lane.b32.xlu1 %v2889_v55, %s2579_s27 }
 0x190   : > { %v3032_v3 = vpop.permute.xlu0 %790  ;;  %v3034_v4 = vpop.permute.xlu1 %786 }
 0x191   : > { %v3038_v5 = vsel %vm796_vm11, %v785_v13, %v3034_v4 }
 0x192   : > { %1471 = vrot.lane.b32.xlu0 %v2885_v52, %s2582_s8  ;;  %1311 = vrot.lane.b32.xlu1 %v2889_v55, %s2593_s16 }
 0x194   : > { %v827_v6 = vpop.permute.xlu0 %826  ;;  %v3044_v63 = vpop.permute.xlu1 %1227 }
 0x195   : > { %v3047_v7 = vsel %vm836_vm12, %v825_v14, %v827_v6 }
 0x196   : > { %1467 = vrot.lane.b32.xlu0 %v2882_v51, %s2582_s8  ;;  %1276 = vrot.lane.b32.xlu1 %v2892_v56, %s2579_s27 }
 0x198   : > { %v867_v8 = vpop.permute.xlu0 %866  ;;  %v3053_v9 = vpop.permute.xlu1 %1270 }
 0x199   : > { %v3056_v10 = vsel %vm876_vm13, %v865_v15, %v867_v8 }
 0x19a   : > { %1510 = vrot.lane.b32.xlu0 %v2885_v52, %s3822_s15  ;;  %1315 = vrot.lane.b32.xlu1 %v2892_v56, %s2593_s16 }
 0x19c   : > { %v831_v21 = vpop.permute.xlu0 %830  ;;  %v3064_v22 = vpop.permute.xlu1 %1349 }
 0x19e   : > { %1550 = vrot.lane.b32.xlu0 %v2885_v52, %s2583_s9  ;;  %1351 = vrot.lane.b32.xlu1 %v2889_v55, %s2591_s13 }
 0x1a0   : > { %v871_v23 = vpop.permute.xlu0 %870  ;;  %v3070_v11 = vpop.permute.xlu1 %1428 }
 0x1a2   : > { %1546 = vrot.lane.b32.xlu0 %v2882_v51, %s2583_s9  ;;  %1391 = vrot.lane.b32.xlu1 %v2889_v55, %s2580_s28 }
 0x1a4   : > { %v907_v24 = vpop.permute.xlu0 %906  ;;  %v3076_v16 = vpop.permute.xlu1 %1506 }
 0x1a5   : > { %3849 = vst [vmem:[#allocation8_spill] sm:$0xff] %v3076_v16  ;;  %v3079_v25 = vsel %vm916_vm14, %v905_v18, %v907_v24 }
 0x1a6   : > { %788 = vrot.lane.b32.xlu0 %v2889_v55, %s2583_s9  ;;  %1355 = vrot.lane.b32.xlu1 %v2892_v56, %s2591_s13 }
 0x1a8   : > { %v947_v26 = vpop.permute.xlu0 %946  ;;  %v3085_v27 = vpop.permute.xlu1 %792 }
 0x1a9   : > { %3850 = vst [vmem:[#allocation9_spill] sm:$0xff] %v3085_v27  ;;  %v3088_v28 = vsel %vm956_vm15, %v945_v32, %v947_v26  ;;  %v800_v29 = vsel %vm796_vm11, %v3032_v3, %v3085_v27 }
 0x1aa   : > { %1229 = vrot.lane.b32.xlu0 %v2892_v56, %s2578_s21  ;;  %1395 = vrot.lane.b32.xlu1 %v2892_v56, %s2580_s28  ;;  %v2320_v31 = vpack.c.bf16 %v800_v29, %v1738_v30 }
 0x1ac   : > { %v911_v34 = vpop.permute.xlu0 %910  ;;  %v829_v35 = vpop.permute.xlu1 %828  ;;  %2321 = vmatprep.subr.bf16.mxu0 %v2320_v31 }
 0x1ad   : > { %v3100_v36 = vsel %vm836_vm12, %v827_v6, %v829_v35  ;;  %v3103_v37 = vsel %vm836_vm12, %v829_v35, %v831_v21 }
 0x1ae   : > { %1278 = vrot.lane.b32.xlu0 %v2903_v12, %s2579_s27  ;;  %1430 = vrot.lane.b32.xlu1 %v2889_v55, %s3823_s7 }
 0x1b0   : > { %v951_v39 = vpop.permute.xlu0 %950  ;;  %v869_v40 = vpop.permute.xlu1 %868 }
 0x1b1   : > { %v3110_v19 = vsel %vm876_vm13, %v867_v8, %v869_v40  ;;  %v3113_v41 = vsel %vm876_vm13, %v869_v40, %v871_v23 }
 0x1b2   : > { %1317 = vrot.lane.b32.xlu0 %v2903_v12, %s2593_s16  ;;  %1469 = vrot.lane.b32.xlu1 %v2889_v55, %s2582_s8 }
 0x1b4   : > { %v987_v43 = vpop.permute.xlu0 %986  ;;  %v3123_v44 = vpop.permute.xlu1 %832 }
 0x1b5   : > { %3851 = vst [vmem:[#allocation10_spill] sm:$0xff] %v3123_v44  ;;  %v3127_v45 = vsel %vm996_vm0, %v2994_v58, %v987_v43  ;;  %v3131_v46 = vsel %vm836_vm12, %v831_v21, %v3123_v44 }
 0x1b6   : > { %1357 = vrot.lane.b32.xlu0 %v2903_v12, %s2591_s13  ;;  %1434 = vrot.lane.b32.xlu1 %v2892_v56, %s3823_s7 }
 0x1b8   : > { %v1027_v47 = vpop.permute.xlu0 %1026  ;;  %v3137_v48 = vpop.permute.xlu1 %872 }
 0x1b9   : > { %3852 = vst [vmem:[#allocation11_spill] sm:$0xff] %v3137_v48  ;;  %v3141_v20 = vsel %vm3824_vm3, %v3004_v59, %v1027_v47  ;;  %v3145_v49 = vsel %vm876_vm13, %v871_v23, %v3137_v48 }
 0x1ba   : > { %1397 = vrot.lane.b32.xlu0 %v2903_v12, %s2580_s28  ;;  %1473 = vrot.lane.b32.xlu1 %v2892_v56, %s2582_s8 }
 0x1bc   : > { %v991_v54 = vpop.permute.xlu0 %990  ;;  %v909_v57 = vpop.permute.xlu1 %908 }
 0x1bd   : > { %v3156_v13 = vsel %vm916_vm14, %v907_v24, %v909_v57  ;;  %v3159_v14 = vsel %vm916_vm14, %v909_v57, %v911_v34 }
 0x1be   : > { %1436 = vrot.lane.b32.xlu0 %v2903_v12, %s3823_s7  ;;  %1508 = vrot.lane.b32.xlu1 %v2889_v55, %s3822_s15 }
 0x1c0   : > { %v1031_v15 = vpop.permute.xlu0 %1030  ;;  %v949_v18 = vpop.permute.xlu1 %948 }
 0x1c1   : > { %v3166_v32 = vsel %vm956_vm15, %v947_v26, %v949_v18  ;;  %v3169_v58 = vsel %vm956_vm15, %v949_v18, %v951_v39 }
 0x1c2   : > { %1475 = vrot.lane.b32.xlu0 %v2903_v12, %s2582_s8  ;;  %1548 = vrot.lane.b32.xlu1 %v2889_v55, %s2583_s9 }
 0x1c4   : > { %v1066_v8 = vpop.permute.xlu0 %1065  ;;  %v3179_v21 = vpop.permute.xlu1 %912 }
 0x1c5   : > { %3853 = vst [vmem:[#allocation12_spill] sm:$0xff] %v3179_v21  ;;  %v3183_v23 = vsel %vm358_vm4, %v3006_v60, %v1066_v8  ;;  %v3187_v24 = vsel %vm916_vm14, %v911_v34, %v3179_v21 }
 0x1c6   : > { %1514 = vrot.lane.b32.xlu0 %v2903_v12, %s3822_s15  ;;  %1512 = vrot.lane.b32.xlu1 %v2892_v56, %s3822_s15 }
 0x1c8   : > { %v1105_v26 = vpop.permute.xlu0 %1104  ;;  %v3193_v29 = vpop.permute.xlu1 %952 }
 0x1c9   : > { %3854 = vst [vmem:[#allocation13_spill] sm:$0xff] %v3193_v29  ;;  %v3197_v30 = vsel %vm3840_vm5, %v3012_v61, %v1105_v26  ;;  %v3201_v60 = vsel %vm956_vm15, %v951_v39, %v3193_v29 }
 0x1ca   : > { %1554 = vrot.lane.b32.xlu0 %v2903_v12, %s2583_s9  ;;  %1552 = vrot.lane.b32.xlu1 %v2892_v56, %s2583_s9 }
 0x1cc   : > { %v1070_v35 = vpop.permute.xlu0 %1069  ;;  %v989_v40 = vpop.permute.xlu1 %988 }
 0x1cd   : > { %v3212_v61 = vsel %vm996_vm0, %v987_v43, %v989_v40  ;;  %v3215_v39 = vsel %vm996_vm0, %v989_v40, %v991_v54 }
 0x1ce   : > { %1589 = vrot.lane.b32.xlu0 %v2885_v52, %s2584_s11  ;;  %1587 = vrot.lane.b32.xlu1 %v2889_v55, %s2584_s11 }
 0x1d0   : > { %v1109_v57 = vpop.permute.xlu0 %1108  ;;  %v1029_v18 = vpop.permute.xlu1 %1028 }
 0x1d1   : > { %v3222_v53 = vsel %vm3824_vm3, %v1027_v47, %v1029_v18  ;;  %v3225_v34 = vsel %vm3824_vm3, %v1029_v18, %v1031_v15 }
 0x1d2   : > { %1628 = vrot.lane.b32.xlu0 %v2885_v52, %s2585_s12  ;;  %1626 = vrot.lane.b32.xlu1 %v2889_v55, %s2585_s12 }
 0x1d4   : > { %v1144_v33 = vpop.permute.xlu0 %1143  ;;  %v3235_v6 = vpop.permute.xlu1 %992 }
 0x1d5   : > { %3855 = vst [vmem:[#allocation14_spill] sm:$0xff] %v3235_v6  ;;  %v3239_v47 = vsel %vm1153_vm1, %v3014_v62, %v1144_v33  ;;  %v3243_v18 = vsel %vm996_vm0, %v991_v54, %v3235_v6 }
 0x1d6   : > { %3856 = vst [vmem:[#allocation15_spill] sm:$0xff] %v3239_v47  ;;  %1624 = vrot.lane.b32.xlu0 %v2882_v51, %s2585_s12  ;;  %1585 = vrot.lane.b32.xlu1 %v2882_v51, %s2584_s11 }
 0x1d8   : > { %v1184_v43 = vpop.permute.xlu0 %1183  ;;  %v3249_v40 = vpop.permute.xlu1 %1032 }
 0x1d9   : > { %3857 = vst [vmem:[#allocation16_spill] sm:$0xff] %v3249_v40  ;;  %v3253_v59 = vsel %vm3838_vm2, %v3024_v0, %v1184_v43  ;;  %v3257_v62 = vsel %vm3824_vm3, %v1031_v15, %v3249_v40  ;;  %vm1883_vm3 = vcmask 654336  }
 0x1da   : > { %3858 = vst [vmem:[#allocation17_spill] sm:$0xff] %v3253_v59  ;;  %1593 = vrot.lane.b32.xlu0 %v2903_v12, %s2584_s11  ;;  %1591 = vrot.lane.b32.xlu1 %v2892_v56, %s2584_s11  ;;  %v1735_v59 = vld [vmem:[#allocation2] sm:$0xff] }
 0x1dc   : > { %v1148_v17 = vpop.permute.xlu0 %1147  ;;  %v1068_v42 = vpop.permute.xlu1 %1067 }
 0x1dd   : > { %v3268_v0 = vsel %vm358_vm4, %v1066_v8, %v1068_v42  ;;  %v3271_v15 = vsel %vm358_vm4, %v1068_v42, %v1070_v35 }
 0x1de   : > { %1632 = vrot.lane.b32.xlu0 %v2903_v12, %s2585_s12  ;;  %1630 = vrot.lane.b32.xlu1 %v2892_v56, %s2585_s12 }
 0x1e0   : > { %v1188_v38 = vpop.permute.xlu0 %1187  ;;  %v1107_v50 = vpop.permute.xlu1 %1106 }
 0x1e1   : > { %v3278_v54 = vsel %vm3840_vm5, %v1105_v26, %v1107_v50  ;;  %v3281_v31 = vsel %vm3840_vm5, %v1107_v50, %v1109_v57  ;;  %v3294_v26 = vld [vmem:[%s3819_s4 + $0x8] sm:$0xff] }
 0x1e2   : > { %1667 = vrot.lane.b32.xlu0 %v2885_v52, %s2586_s14  ;;  %1665 = vrot.lane.b32.xlu1 %v2889_v55, %s2586_s14  ;;  %3859 = vst [vmem:[#allocation18_spill] sm:$0xff] %v3294_v26 }
 0x1e3   : > { %2250 = vmatprep.mubr.msk.f32.mxu1 %vm1883_vm3, %v3294_v26  ;;  %2253 = vmatprep.mubr.msk.f32.mxu0 %vm1883_vm3, %v3294_v26 }
 0x1e4   : > { %v1224_v50 = vpop.permute.xlu0 %1223  ;;  %v3300_v1 = vpop.permute.xlu1 %1071 }
 0x1e5   : > { %3860 = vst [vmem:[#allocation19_spill] sm:$0xff] %v3300_v1  ;;  %v3304_v42 = vsel %vm400_vm6, %v3026_v2, %v1224_v50  ;;  %v3308_v8 = vsel %vm358_vm4, %v1070_v35, %v3300_v1 }
 0x1e6   : > { %3861 = vst [vmem:[#allocation20_spill] sm:$0xff] %v3304_v42  ;;  %1706 = vrot.lane.b32.xlu0 %v2885_v52, %s2587_s17  ;;  %1704 = vrot.lane.b32.xlu1 %v2889_v55, %s2587_s17 }
 0x1e8   : > { %v1275_v40 = vpop.permute.xlu0 %1274  ;;  %v3314_v29 = vpop.permute.xlu1 %1110 }
 0x1e9   : > { %3862 = vst [vmem:[#allocation21_spill] sm:$0xff] %v3314_v29  ;;  %v3318_v26 = vsel %vm3840_vm5, %v1109_v57, %v3314_v29  ;;  %vm3845_vm5 = vcmask 801792  }
 0x1ea   : > { %1702 = vrot.lane.b32.xlu0 %v2882_v51, %s2587_s17  ;;  %1663 = vrot.lane.b32.xlu1 %v2882_v51, %s2586_s14 }
 0x1ec   : > { %v1314_v2 = vpop.permute.xlu0 %1313  ;;  %v1146_v35 = vpop.permute.xlu1 %1145 }
 0x1ed   : > { %v3325_v52 = vsel %vm1153_vm1, %v1144_v33, %v1146_v35  ;;  %v3328_v55 = vsel %vm1153_vm1, %v1146_v35, %v1148_v17 }
 0x1ee   : > { %1671 = vrot.lane.b32.xlu0 %v2903_v12, %s2586_s14  ;;  %1669 = vrot.lane.b32.xlu1 %v2892_v56, %s2586_s14 }
 0x1f0   : > { %v1310_v57 = vpop.permute.xlu0 %1309  ;;  %v1186_v29 = vpop.permute.xlu1 %1185 }
 0x1f1   : > { %v3335_v1 = vsel %vm3838_vm2, %v1184_v43, %v1186_v29  ;;  %v3338_v51 = vsel %vm3838_vm2, %v1186_v29, %v1188_v38 }
 0x1f2   : > { %1710 = vrot.lane.b32.xlu0 %v2903_v12, %s2587_s17  ;;  %1708 = vrot.lane.b32.xlu1 %v2892_v56, %s2587_s17 }
 0x1f4   : > { %v1354_v33 = vpop.permute.xlu0 %1353  ;;  %v3344_v35 = vpop.permute.xlu1 %1149 }
 0x1f5   : > { %3863 = vst [vmem:[#allocation22_spill] sm:$0xff] %v3344_v35  ;;  %v3348_v6 = vsel %vm1153_vm1, %v1148_v17, %v3344_v35 }
 0x1f6   : > { %834 = vrot.lane.b32.xlu0 %v2903_v12, %s2584_s11  ;;  %794 = vrot.lane.b32.xlu1 %v2903_v12, %s2583_s9 }
 0x1f8   : > { %v3354_v29 = vpop.permute.xlu0 %1393  ;;  %v3356_v43 = vpop.permute.xlu1 %1189 }
 0x1f9   : > { %3864 = vst [vmem:[#allocation23_spill] sm:$0xff] %v3356_v43  ;;  %v3360_v56 = vsel %vm3838_vm2, %v1188_v38, %v3356_v43  ;;  %vm1321_vm2 = vcmask 1031168  }
 0x1fa   : > { %914 = vrot.lane.b32.xlu0 %v2903_v12, %s2586_s14  ;;  %874 = vrot.lane.b32.xlu1 %v2903_v12, %s2585_s12 }
 0x1fc   : > { %v1390_v17 = vpop.permute.xlu0 %1389  ;;  %v1226_v35 = vpop.permute.xlu1 %1225 }
 0x1fd   : > { %v3367_v48 = vsel %vm400_vm6, %v1224_v50, %v1226_v35  ;;  %v3371_v21 = vsel %vm400_vm6, %v1226_v35, %v3044_v63 }
 0x1fe   : > { %3865 = vst [vmem:[#allocation24_spill] sm:$0xff] %v3371_v21  ;;  %994 = vrot.lane.b32.xlu0 %v2903_v12, %s2588_s24  ;;  %954 = vrot.lane.b32.xlu1 %v2903_v12, %s2587_s17 }
 0x200   : > { %v3377_v38 = vpop.permute.xlu0 %1432  ;;  %v1273_v43 = vpop.permute.xlu1 %1272 }
 0x201   : > { %v3381_v27 = vsel %vm427_vm7, %v3053_v9, %v1273_v43  ;;  %v3384_v50 = vsel %vm427_vm7, %v1273_v43, %v1275_v40 }
 0x202   : > { %3866 = vst [vmem:[#allocation25_spill] sm:$0xff] %v3381_v27  ;;  %3867 = vst [vmem:[#allocation26_spill] sm:$0xff] %v3384_v50  ;;  %1073 = vrot.lane.b32.xlu0 %v2903_v12, %s2576_s19  ;;  %1034 = vrot.lane.b32.xlu1 %v2903_v12, %s2575_s18  ;;  %s3880_s18 = smov 96   ;;  %s3881_s19 = smov 94  }
 0x204   : > { %v3390_v35 = vpop.permute.xlu0 %1471  ;;  %v1312_v44 = vpop.permute.xlu1 %1311 }
 0x205   : > { %v3393_v42 = vsel %vm1321_vm2, %v1310_v57, %v1312_v44  ;;  %v3396_v21 = vsel %vm1321_vm2, %v1312_v44, %v1314_v2 }
 0x206   : > { %3868 = vst [vmem:[#allocation27_spill] sm:$0xff] %v3393_v42  ;;  %3869 = vst [vmem:[#allocation28_spill] sm:$0xff] %v3396_v21  ;;  %1151 = vrot.lane.b32.xlu0 %v2903_v12, %s2589_s30  ;;  %1112 = vrot.lane.b32.xlu1 %v2903_v12, %s2577_s20  ;;  %v3873_v21 = vmov 0.0  }
 0x208   : > { %v3402_v9 = vpop.permute.xlu0 %1467  ;;  %v1277_v43 = vpop.permute.xlu1 %1276 }
 0x209   : > { %v3405_v27 = vsel %vm427_vm7, %v1275_v40, %v1277_v43 }
 0x20a   : > { %3870 = vst [vmem:[#allocation29_spill] sm:$0xff] %v3405_v27  ;;  %1231 = vrot.lane.b32.xlu0 %v2903_v12, %s2578_s21  ;;  %1191 = vrot.lane.b32.xlu1 %v2903_v12, %s2590_s10 }
 0x20c   : > { %v3411_v44 = vpop.permute.xlu0 %1510  ;;  %v1316_v57 = vpop.permute.xlu1 %1315 }
 0x20d   : > { %3871 = vst [vmem:[#allocation30_spill] sm:$0xff] %v3411_v44  ;;  %v3414_v42 = vsel %vm1321_vm2, %v1314_v2, %v1316_v57  ;;  %v2270_v44 = vpack.c.bf16 %v3038_v5, %v1735_v59  ;;  %v3883_v5 = vpack.c.bf16 %v3110_v19, %v3100_v36  ;;  %v3885_v36 = vpack.c.bf16 %v3056_v10, %v3047_v7 }
 0x20e   : > { %3872 = vst [vmem:[#allocation31_spill] sm:$0xff] %v3414_v42  ;;  %1319 = vrot.lane.b32.xlu0 %v3873_v21, %s2593_s16  ;;  %1280 = vrot.lane.b32.xlu1 %v3873_v21, %s2579_s27  ;;  %v3887_v19 = vpack.c.bf16 %v3166_v32, %v3156_v13  ;;  %v3889_v13 = vpack.c.bf16 %v3088_v28, %v3079_v25  ;;  %s2440_s16 = smul.u32 120, %s3937_s25 }
 0x20f   : > { %v3890_v32 = vpack.c.bf16 %v3257_v62, %v3243_v18  ;;  %v3892_v28 = vpack.c.bf16 %v3225_v34, %v3215_v39  ;;  %v1867_v18 = vld [vmem:[%s3820_s5 + $0x10] sm:$0xf]  ;;  %v3894_v34 = vpack.c.bf16 %v3278_v54, %v3268_v0  ;;  %v2340_v39 = vpack.c.bf16 %v3360_v56, %v3348_v6  ;;  %v1803_v0 = vld [vmem:[#allocation2 + $0x220] sm:$0xff] }
 0x210   : > { %v3420_v40 = vpop.permute.xlu0 %1550  ;;  %v1352_v27 = vpop.permute.xlu1 %1351  ;;  %v3896_v6 = vpack.c.bf16 %v3197_v30, %v3183_v23  ;;  %v3897_v30 = vld [vmem:[#allocation8_spill] sm:$0xff]  ;;  %s3785_s20 = scalar_lea.vmem %s3821_s6, %s2440_s16 }
 0x211   : > { %3874 = vst [vmem:[#allocation32_spill] sm:$0xff] %v3420_v40  ;;  %v3424_v50 = vsel %vm3845_vm5, %v3064_v22, %v1352_v27  ;;  %v3427_v12 = vsel %vm3845_vm5, %v1352_v27, %v1354_v33 }
 0x212   : > { %3875 = vst [vmem:[#allocation33_spill] sm:$0xff] %v3424_v50  ;;  %3876 = vst [vmem:[#allocation34_spill] sm:$0xff] %v3427_v12  ;;  %1399 = vrot.lane.b32.xlu0 %v3873_v21, %s2580_s28  ;;  %1359 = vrot.lane.b32.xlu1 %v3873_v21, %s2591_s13 }
 0x214   : > { %v3433_v2 = vpop.permute.xlu0 %1546  ;;  %v1392_v42 = vpop.permute.xlu1 %1391 }
 0x215   : > { %3877 = vst [vmem:[#allocation35_spill] sm:$0xff] %v3433_v2  ;;  %v3436_v47 = vsel %vm448_vm8, %v1390_v17, %v1392_v42  ;;  %v3440_v40 = vsel %vm448_vm8, %v1392_v42, %v3354_v29  ;;  %v1736_v42 = vld [vmem:[#allocation2 + $0x8] sm:$0xff] }
 0x216   : > { %3878 = vst [vmem:[#allocation36_spill] sm:$0xff] %v3436_v47  ;;  %3879 = vst [vmem:[#allocation37_spill] sm:$0xff] %v3440_v40  ;;  %1477 = vrot.lane.b32.xlu0 %v3873_v21, %s2582_s8  ;;  %1438 = vrot.lane.b32.xlu1 %v3873_v21, %s3880_s18  ;;  %v1737_v47 = vld [vmem:[#allocation2 + $0x10] sm:$0xff] }
 0x218   : > { %v789_v22 = vpop.permute.xlu0 %788  ;;  %v1356_v27 = vpop.permute.xlu1 %1355 }
 0x219   : > { %v798_v50 = vsel %vm796_vm11, %v3034_v4, %v789_v22  ;;  %v799_v12 = vsel %vm796_vm11, %v789_v22, %v3032_v3  ;;  %v3451_v17 = vsel %vm3845_vm5, %v1354_v33, %v1356_v27 }
 0x21a   : > { %1556 = vrot.lane.b32.xlu0 %v3873_v21, %s2583_s9  ;;  %1516 = vrot.lane.b32.xlu1 %v3873_v21, %s3881_s19  ;;  %v2322_v40 = vpack.c.bf16 %v799_v12, %v1737_v47  ;;  %v2268_v2 = vpack.c.bf16 %v798_v50, %v1736_v42  ;;  %v3882_v47 = vpack.c.bf16 %v3145_v49, %v3131_v46  ;;  %v1802_v12 = vld [vmem:[#allocation2 + $0x218] sm:$0xff] }
 0x21c   : > { %v3458_v4 = vpop.permute.xlu0 %1229  ;;  %v1396_v16 = vpop.permute.xlu1 %1395  ;;  %2323 = vmatpush1.bf16.msra.mxu0 %v2322_v40  ;;  %2269 = vmatprep.subr.bf16.mxu1 %v2268_v2  ;;  %v3902_v2 = vld [vmem:[#allocation24_spill] sm:$0xff] }
 0x21d   : > { %v3463_v3 = vsel %vm400_vm6, %v3044_v63, %v3458_v4  ;;  %v3467_v33 = vsel %vm448_vm8, %v3354_v29, %v1396_v16  ;;  %2271 = vmatpush1.bf16.msra.mxu1 %v2270_v44  ;;  %2325 = vmatprep.subr.bf16.mxu0 %v3882_v47  ;;  %v3884_v29 = vpack.c.bf16 %v3113_v41, %v3103_v37  ;;  %v3898_v44 = vld [vmem:[#allocation30_spill] sm:$0xff] }
 0x21e   : > { %1634 = vrot.lane.b32.xlu0 %v3873_v21, %s2585_s12  ;;  %1595 = vrot.lane.b32.xlu1 %v3873_v21, %s2584_s11  ;;  %v3886_v37 = vpack.c.bf16 %v3201_v60, %v3187_v24  ;;  %v3888_v41 = vpack.c.bf16 %v3169_v58, %v3159_v14  ;;  %v1865_v14 = vld [vmem:[%s3820_s5] sm:$0xff]  ;;  %v3891_v58 = vpack.c.bf16 %v3222_v53, %v3212_v61 }
 0x21f   : > { %2273 = vmatprep.subr.bf16.mxu1 %v3883_v5  ;;  %v3893_v61 = vpack.c.bf16 %v3141_v20, %v3127_v45  ;;  %v2288_v45 = vpack.c.bf16 %v3335_v1, %v3325_v52  ;;  %v2344_v1 = vpack.c.bf16 %v1803_v0, %v3463_v3  ;;  %v2346_v22 = vpack.c.bf16 %v1802_v12, %v3902_v2 }
 0x220   : > { %v3479_v63 = vpop.permute.xlu0 %1278  ;;  %v1431_v59 = vpop.permute.xlu1 %1430  ;;  %2327 = vmatpush1.bf16.msra.mxu0 %v3884_v29  ;;  %v3905_v29 = vld [vmem:[#allocation28_spill] sm:$0xff] }
 0x221   : > { %v3486_v46 = vsel %vm427_vm7, %v1277_v43, %v3479_v63  ;;  %v3490_v49 = vsel %vm469_vm9, %v3070_v11, %v1431_v59  ;;  %v3494_v50 = vsel %vm469_vm9, %v1431_v59, %v3377_v38  ;;  %2275 = vmatpush1.bf16.msra.mxu1 %v3885_v36  ;;  %2329 = vmatprep.subr.bf16.mxu0 %v3886_v37  ;;  %v1866_v11 = vld [vmem:[%s3820_s5 + $0x8] sm:$0xff] }
 0x222   : > { %1712 = vrot.lane.b32.xlu0 %v3873_v21, %s2587_s17  ;;  %1673 = vrot.lane.b32.xlu1 %v3873_v21, %s2586_s14  ;;  %v3904_v59 = vld [vmem:[#allocation26_spill] sm:$0xff] }
 0x223   : > { %2277 = vmatprep.subr.bf16.mxu1 %v3887_v19  ;;  %v2296_v36 = vpack.c.bf16 %v3905_v29, %v3904_v59 }
 0x224   : > { %v3512_v7 = vpop.permute.xlu0 %1317  ;;  %v1470_v10 = vpop.permute.xlu1 %1469  ;;  %2331 = vmatpush1.bf16.msra.mxu0 %v3888_v41 }
 0x225   : > { %v1325_v24 = vsel %vm1321_vm2, %v1316_v57, %v3512_v7  ;;  %v3521_v21 = vsel %vm490_vm10, %v3402_v9, %v1470_v10  ;;  %v3525_v60 = vsel %vm490_vm10, %v1470_v10, %v3390_v35  ;;  %2279 = vmatpush1.bf16.msra.mxu1 %v3889_v13  ;;  %2333 = vmatprep.subr.bf16.mxu0 %v3890_v32  ;;  %v3907_v10 = vld [vmem:[#allocation32_spill] sm:$0xff]  ;;  %v3910_v32 = vld [vmem:[#allocation25_spill] sm:$0xff] }
 0x226   : > { %1875 = vperm.xlu0 %2503, %v1866_v11   ;;  %2281 = vmatprep.subr.bf16.mxu1 %v3891_v58  ;;  %v2336_v9 = vpack.c.bf16 %v3318_v26, %v3308_v8  ;;  %v2348_v3 = vpack.c.bf16 %v1325_v24, %v3486_v46  ;;  %v3906_v11 = vld [vmem:[#allocation35_spill] sm:$0xff]  ;;  %v3908_v46 = vld [vmem:[#allocation29_spill] sm:$0xff] }
 0x227   : > { %1870 = vperm.xlu1 %2504, %v1865_v14   ;;  %v3909_v24 = vld [vmem:[#allocation31_spill] sm:$0xff] }
 0x228   : > { %v3541_v43 = vpop.permute.xlu0 %1357  ;;  %v1435_v25 = vpop.permute.xlu1 %1434  ;;  %2335 = vmatpush1.bf16.msra.mxu0 %v3892_v28  ;;  %v2350_v13 = vpack.c.bf16 %v3909_v24, %v3908_v46  ;;  %v3911_v14 = vld [vmem:[#allocation27_spill] sm:$0xff] }
 0x229   : > { %v1365_v62 = vsel %vm3845_vm5, %v1356_v27, %v3541_v43  ;;  %v3553_v53 = vsel %vm469_vm9, %v3377_v38, %v1435_v25  ;;  %2283 = vmatpush1.bf16.msra.mxu1 %v3893_v61  ;;  %2337 = vmatprep.subr.bf16.mxu0 %v2336_v9  ;;  %v3895_v38 = vpack.c.bf16 %v3281_v31, %v3271_v15  ;;  %vm1518_vm5 = vcmask 769024   ;;  %v1801_v15 = vld [vmem:[#allocation2 + $0x210] sm:$0xff]  ;;  %v1800_v27 = vld [vmem:[#allocation2 + $0x208] sm:$0xff]  ;;  %v3913_v61 = vld [vmem:[#allocation37_spill] sm:$0xff] }
 0x22a   : > { %2285 = vmatprep.subr.bf16.mxu1 %v3894_v34  ;;  %v2342_v31 = vpack.c.bf16 %v3338_v51, %v3328_v55  ;;  %v2292_v56 = vpack.c.bf16 %v1801_v15, %v3367_v48  ;;  %v3899_v55 = vld [vmem:[#allocation17_spill] sm:$0xff]  ;;  %v3900_v51 = vld [vmem:[#allocation15_spill] sm:$0xff]  ;;  %v3903_v48 = vld [vmem:[#allocation20_spill] sm:$0xff]  ;;  %v2298_v58 = vpack.c.bf16 %v3911_v14, %v3910_v32 }
 0x22b   : > { %1880 = vperm.xlu1 %2504, %v1867_v18   ;;  %v3901_v40 = vpack.c.bf16 %v3899_v55, %v3900_v51  ;;  %v2294_v42 = vpack.c.bf16 %v1800_v27, %v3903_v48  ;;  %v3912_v18 = vld [vmem:[#allocation34_spill] sm:$0xff] }
 0x22c   : > { %v3563_v8 = vpop.permute.xlu0 %1397  ;;  %v1474_v26 = vpop.permute.xlu1 %1473  ;;  %2339 = vmatpush1.bf16.msra.mxu0 %v3895_v38  ;;  %v2300_v34 = vpack.c.bf16 %v3913_v61, %v3912_v18  ;;  %v2354_v38 = vpack.c.bf16 %v3467_v33, %v3451_v17  ;;  %v3658_v61 = vld [vmem:[%s3819_s4] sm:$0xff] }
 0x22d   : > { %v1404_v20 = vsel %vm448_vm8, %v1396_v16, %v3563_v8  ;;  %v3574_v54 = vsel %vm490_vm10, %v3390_v35, %v1474_v26  ;;  %2287 = vmatpush1.bf16.msra.mxu1 %v3896_v6  ;;  %2341 = vmatprep.subr.bf16.mxu0 %v2340_v39 }
 0x22e   : > { %2289 = vmatprep.subr.bf16.mxu1 %v2288_v45  ;;  %v2352_v9 = vpack.c.bf16 %v1404_v20, %v1365_v62  ;;  %v3914_v62 = vld [vmem:[#allocation33_spill] sm:$0xff]  ;;  %v3915_v45 = vld [vmem:[#allocation36_spill] sm:$0xff]  ;;  %v2358_v17 = vpack.c.bf16 %v3574_v54, %v3553_v53 }
 0x22f   : > { %v2302_v20 = vpack.c.bf16 %v3915_v45, %v3914_v62 }
 0x230   : > { %v3582_v52 = vpop.permute.xlu0 %1436  ;;  %v1509_v16 = vpop.permute.xlu1 %1508  ;;  %2343 = vmatpush1.bf16.msra.mxu0 %v2342_v31 }
 0x231   : > { %v1443_v23 = vsel %vm469_vm9, %v1435_v25, %v3582_v52  ;;  %v1519_v35 = vsel %vm1518_vm5, %v3897_v30, %v1509_v16  ;;  %v1520_v57 = vsel %vm1518_vm5, %v1509_v16, %v3898_v44  ;;  %2291 = vmatpush1.bf16.msra.mxu1 %v3901_v40  ;;  %2345 = vmatprep.subr.bf16.mxu0 %v2344_v1 }
 0x232   : > { %2293 = vmatprep.subr.bf16.mxu1 %v2292_v56  ;;  %v2304_v1 = vpack.c.bf16 %v3525_v60, %v3494_v50  ;;  %v2306_v56 = vpack.c.bf16 %v3521_v21, %v3490_v49 }
 0x234   : > { %v3597_v47 = vpop.permute.xlu0 %1475  ;;  %v1549_v5 = vpop.permute.xlu1 %1548  ;;  %2347 = vmatpush1.bf16.msra.mxu0 %v2346_v22 }
 0x235   : > { %v1482_v37 = vsel %vm490_vm10, %v1474_v26, %v3597_v47  ;;  %v1558_v19 = vsel %vm796_vm11, %v3906_v11, %v1549_v5  ;;  %v1559_v41 = vsel %vm796_vm11, %v1549_v5, %v3907_v10  ;;  %2295 = vmatpush1.bf16.msra.mxu1 %v2294_v42  ;;  %2349 = vmatprep.subr.bf16.mxu0 %v2348_v3 }
 0x236   : > { %2297 = vmatprep.subr.bf16.mxu1 %v2296_v36  ;;  %v2356_v6 = vpack.c.bf16 %v1482_v37, %v1443_v23  ;;  %v2308_v50 = vpack.c.bf16 %v1559_v41, %v1520_v57  ;;  %v2310_v55 = vpack.c.bf16 %v1558_v19, %v1519_v35 }
 0x238   : > { %v3611_v25 = vpop.permute.xlu0 %1514  ;;  %v1513_v28 = vpop.permute.xlu1 %1512  ;;  %2351 = vmatpush1.bf16.msra.mxu0 %v2350_v13 }
 0x239   : > { %v1521_v39 = vsel %vm1518_vm5, %v3898_v44, %v1513_v28  ;;  %v1522_v26 = vsel %vm1518_vm5, %v1513_v28, %v3611_v25  ;;  %2299 = vmatpush1.bf16.msra.mxu1 %v2298_v58  ;;  %2353 = vmatprep.subr.bf16.mxu0 %v2352_v9 }
 0x23a   : > { %2301 = vmatprep.subr.bf16.mxu1 %v2300_v34 }
 0x23c   : > { %v3623_v31 = vpop.permute.xlu0 %1554  ;;  %v1553_v0 = vpop.permute.xlu1 %1552  ;;  %2355 = vmatpush1.bf16.msra.mxu0 %v2354_v38  ;;  %v2594_v38 = vmov 0.0|0.0  }
 0x23d   : > { %v1560_v15 = vsel %vm796_vm11, %v3907_v10, %v1553_v0  ;;  %v1561_v16 = vsel %vm796_vm11, %v1553_v0, %v3623_v31  ;;  %2303 = vmatpush1.bf16.msra.mxu1 %v2302_v20  ;;  %2357 = vmatprep.subr.bf16.mxu0 %v2356_v6  ;;  %v3674_v20 = vld [vmem:[%s3819_s4 + $0x10] sm:$0xff] }
 0x23e   : > { %2305 = vmatprep.subr.bf16.mxu1 %v2304_v1  ;;  %v2360_v33 = vpack.c.bf16 %v1561_v16, %v1522_v26  ;;  %v2362_v44 = vpack.c.bf16 %v1560_v15, %v1521_v39  ;;  %v1732_v26 = vld [vmem:[%s3819_s4 + $0x18] sm:$0xff]  ;;  %v3682_v1 = vld [vmem:[%s3819_s4 + $0x28] sm:$0xf] }
 0x240   : > { %v1590_v23 = vpop.permute.xlu0 %1589  ;;  %v1588_v30 = vpop.permute.xlu1 %1587  ;;  %2359 = vmatpush1.bf16.msra.mxu0 %v2358_v17 }
 0x241   : > { %v1598_v60 = vsel %vm836_vm12, %v1588_v30, %v1590_v23  ;;  %2307 = vmatpush1.bf16.msra.mxu1 %v2306_v56  ;;  %2361 = vmatprep.subr.bf16.mxu0 %v2360_v33  ;;  %v3690_v56 = vld [vmem:[%s3819_s4 + $0x20] sm:$0xf] }
 0x242   : > { %2309 = vmatprep.subr.bf16.mxu1 %v2308_v50  ;;  %v3917_v50 = vld [vmem:[#allocation9_spill] sm:$0xff] }
 0x244   : > { %v1629_v51 = vpop.permute.xlu0 %1628  ;;  %v1627_v40 = vpop.permute.xlu1 %1626  ;;  %2363 = vmatpush1.bf16.msra.mxu0 %v2362_v44  ;;  %v1739_v44 = vld [vmem:[#allocation2 + $0x20] sm:$0xff] }
 0x245   : > { %v1637_v53 = vsel %vm876_vm13, %v1627_v40, %v1629_v51  ;;  %2311 = vmatpush1.bf16.msra.mxu1 %v2310_v55 }
 0x246   : > { %v2312_v54 = vpack.c.bf16 %v1637_v53, %v1598_v60  ;;  %v3918_v53 = vld [vmem:[#allocation12_spill] sm:$0xff] }
 0x248   : > { %v1625_v12 = vpop.permute.xlu0 %1624  ;;  %v1586_v49 = vpop.permute.xlu1 %1585  ;;  %2313 = vmatprep.subr.bf16.mxu1 %v2312_v54 }
 0x249   : > { %v1636_v21 = vsel %vm876_vm13, %v1625_v12, %v1627_v40  ;;  %v1597_v57 = vsel %vm836_vm12, %v1586_v49, %v1588_v30  ;;  %v3919_v12 = vld [vmem:[#allocation11_spill] sm:$0xff] }
 0x24a   : > { %v2314_v2 = vpack.c.bf16 %v1636_v21, %v1597_v57 }
 0x24c   : > { %v3639_v22 = vpop.permute.xlu0 %1593  ;;  %v1592_v27 = vpop.permute.xlu1 %1591  ;;  %2315 = vmatpush1.bf16.msra.mxu1 %v2314_v2 }
 0x24d   : > { %v1599_v35 = vsel %vm836_vm12, %v1590_v23, %v1592_v27  ;;  %v1600_v48 = vsel %vm836_vm12, %v1592_v27, %v3639_v22  ;;  %v3916_v23 = vld [vmem:[#allocation10_spill] sm:$0xff] }
 0x24e   : > { %v3920_v27 = vld [vmem:[#allocation14_spill] sm:$0xff] }
 0x250   : > { %v3644_v42 = vpop.permute.xlu0 %1632  ;;  %v1631_v3 = vpop.permute.xlu1 %1630 }
 0x251   : > { %v1638_v5 = vsel %vm876_vm13, %v1629_v51, %v1631_v3  ;;  %v1639_v59 = vsel %vm876_vm13, %v1631_v3, %v3644_v42 }
 0x252   : > { %v2364_v29 = vpack.c.bf16 %v1639_v59, %v1600_v48  ;;  %v2366_v36 = vpack.c.bf16 %v1638_v5, %v1599_v35  ;;  %v3921_v48 = vld [vmem:[#allocation13_spill] sm:$0xff] }
 0x254   : > { %v1668_v37 = vpop.permute.xlu0 %1667  ;;  %v1666_v11 = vpop.permute.xlu1 %1665  ;;  %2365 = vmatprep.subr.bf16.mxu0 %v2364_v29 }
 0x255   : > { %v1676_v19 = vsel %vm916_vm14, %v1666_v11, %v1668_v37  ;;  %2367 = vmatpush1.bf16.msra.mxu0 %v2366_v36  ;;  %v3922_v36 = vld [vmem:[#allocation19_spill] sm:$0xff] }
 0x258   : > { %v1707_v10 = vpop.permute.xlu0 %1706  ;;  %v1705_v41 = vpop.permute.xlu1 %1704 }
 0x259   : > { %v1715_v46 = vsel %vm956_vm15, %v1705_v41, %v1707_v10 }
 0x25a   : > { %v2316_v24 = vpack.c.bf16 %v1715_v46, %v1676_v19 }
 0x25c   : > { %v1703_v13 = vpop.permute.xlu0 %1702  ;;  %v1664_v32 = vpop.permute.xlu1 %1663  ;;  %2317 = vmatprep.subr.bf16.mxu1 %v2316_v24 }
 0x25d   : > { %v1714_v14 = vsel %vm956_vm15, %v1703_v13, %v1705_v41  ;;  %v1675_v58 = vsel %vm916_vm14, %v1664_v32, %v1666_v11  ;;  %v3923_v11 = vld [vmem:[#allocation16_spill] sm:$0xff]  ;;  %v3925_v41 = vld [vmem:[#allocation18_spill] sm:$0xff] }
 0x25e   : > { %v2318_v9 = vpack.c.bf16 %v1714_v14, %v1675_v58  ;;  %v3926_v13 = vld [vmem:[#allocation22_spill] sm:$0xff]  ;;  %v3927_v14 = vld [vmem:[#allocation21_spill] sm:$0xff] }
 0x260   : > { %v3653_v28 = vpop.permute.xlu0 %1671  ;;  %v1670_v18 = vpop.permute.xlu1 %1669  ;;  %2319 = vmatpush1.bf16.msra.mxu1 %v2318_v9 }
 0x261   : > { %v1677_v34 = vsel %vm916_vm14, %v1668_v37, %v1670_v18  ;;  %v1678_v39 = vsel %vm916_vm14, %v1670_v18, %v3653_v28  ;;  %2411 = vmatprep.subr.bf16.mxu1 %v2594_v38 }
 0x263   : > { %1958 = vmatmul.mubr.f32.vlgmr.msra.gmra.mrb[2].mxu1 %v3658_v61 }
 0x264   : > { %v3668_v62 = vpop.permute.xlu0 %1710  ;;  %v1709_v45 = vpop.permute.xlu1 %1708  ;;  %2251 = vmatprep.mubr.msk.f32.mxu1 %vm1883_vm3, %v1732_v26 }
 0x265   : > { %v1716_v6 = vsel %vm956_vm15, %v1707_v10, %v1709_v45  ;;  %v1717_v0 = vsel %vm956_vm15, %v1709_v45, %v3668_v62 }
 0x266   : > { %v2368_v15 = vpack.c.bf16 %v1717_v0, %v1678_v39  ;;  %v2370_v16 = vpack.c.bf16 %v1716_v6, %v1677_v34 }
 0x267   : > { %1964 = vmatmul.mubr.f32.gmra.mrb[4].mxu1 %v3674_v20 }
 0x268   : > { %v835_v17 = vpop.permute.xlu0 %834  ;;  %v795_v33 = vpop.permute.xlu1 %794  ;;  %2369 = vmatprep.subr.bf16.mxu0 %v2368_v15  ;;  %2252 = vmatprep.mubr.msk.f32.mxu1 %vm1883_vm3, %v3682_v1 }
 0x269   : > { %v841_v30 = vsel %vm836_vm12, %v3916_v23, %v835_v17  ;;  %v801_v60 = vsel %vm796_vm11, %v3917_v50, %v795_v33  ;;  %2371 = vmatpush1.bf16.msra.mxu0 %v2370_v16 }
 0x26a   : > { %2372 = vmatprep.subr.bf16.mxu0 %v2594_v38  ;;  %v2373_v55 = vpack.c.bf16 %v801_v60, %v1739_v44 }
 0x26b   : > { %1970 = vmatmul.mubr.f32.gmra.mrb[6].mxu1 %v3690_v56 }
 0x26c   : > { %v915_v51 = vpop.permute.xlu0 %914  ;;  %v875_v40 = vpop.permute.xlu1 %874  ;;  %2041 = vmatmul.mubr.f32.vlgmr.msra.gmra.mrb[4].mxu0 %v3658_v61  ;;  %2424 = vmatpush1.bf16.msra.mxu1 %v2373_v55 }
 0x26d   : > { %v921_v54 = vsel %vm916_vm14, %v3918_v53, %v915_v51  ;;  %v881_v49 = vsel %vm876_vm13, %v3919_v12, %v875_v40  ;;  %2374 = vmatpush1.bf16.msra.mxu0 %v2373_v55  ;;  %2254 = vmatprep.mubr.msk.f32.mxu0 %vm1883_vm3, %v1732_v26 }
 0x26e   : > { %2412 = vmatprep.subr.bf16.mxu1 %v2594_v38  ;;  %2375 = vmatprep.subr.bf16.mxu0 %v2594_v38  ;;  %v2376_v21 = vpack.c.bf16 %v881_v49, %v841_v30 }
 0x26f   : > { %2257 = vmatprep.mubr.msk.f32.mxu1 %vm1883_vm3, %v1732_v26  ;;  %v3929_v26 = vld [vmem:[#allocation23_spill] sm:$0xff] }
 0x270   : > { %v995_v57 = vpop.permute.xlu0 %994  ;;  %v955_v2 = vpop.permute.xlu1 %954  ;;  %2047 = vmatmul.mubr.f32.gmra.mrb[6].mxu0 %v3674_v20  ;;  %2425 = vmatpush1.bf16.msra.mxu1 %v2376_v21 }
 0x271   : > { %v1001_v35 = vsel %vm996_vm0, %v3920_v27, %v995_v57  ;;  %v961_v3 = vsel %vm956_vm15, %v3921_v48, %v955_v2  ;;  %2377 = vmatpush1.bf16.msra.mxu0 %v2376_v21  ;;  %2413 = vmatprep.subr.bf16.mxu1 %v2594_v38  ;;  %vm3924_vm0 = vcmask 269312  }
 0x272   : > { %2378 = vmatprep.subr.bf16.mxu0 %v2594_v38  ;;  %v2379_v5 = vpack.c.bf16 %v961_v3, %v921_v54  ;;  %2255 = vmatprep.mubr.msk.f32.mxu0 %vm1883_vm3, %v3682_v1 }
 0x274   : > { %v1074_v59 = vpop.permute.xlu0 %1073  ;;  %v1035_v29 = vpop.permute.xlu1 %1034  ;;  %2426 = vmatpush1.bf16.msra.mxu1 %v2379_v5  ;;  %2053 = vmatmul.mubr.f32.gmra.mrb[8].mxu0 %v3690_v56 }
 0x275   : > { %v1079_v37 = vsel %vm358_vm4, %v3922_v36, %v1074_v59  ;;  %v1040_v19 = vsel %vm3924_vm0, %v3923_v11, %v1035_v29  ;;  %2380 = vmatpush1.bf16.msra.mxu0 %v2379_v5  ;;  %2414 = vmatprep.subr.bf16.mxu1 %v2594_v38  ;;  %vm3928_vm4 = vcmask 252928   ;;  %vm3930_vm0 = vcmask 15360  }
 0x276   : > { %2381 = vmatprep.subr.bf16.mxu0 %v2594_v38  ;;  %v2382_v10 = vpack.c.bf16 %v1040_v19, %v1001_v35  ;;  %2256 = vmatprep.mubr.msk.f32.mxu0 %vm1883_vm3, %v3925_v41 }
 0x278   : > { %v1152_v46 = vpop.permute.xlu0 %1151  ;;  %v1113_v24 = vpop.permute.xlu1 %1112  ;;  %2427 = vmatpush1.bf16.msra.mxu1 %v2382_v10 }
 0x279   : > { %v1158_v32 = vsel %vm1153_vm1, %v3926_v13, %v1152_v46  ;;  %v1118_v58 = vsel %vm3928_vm4, %v3927_v14, %v1113_v24  ;;  %2383 = vmatpush1.bf16.msra.mxu0 %v2382_v10  ;;  %2415 = vmatprep.subr.bf16.mxu1 %v2594_v38 }
 0x27a   : > { %2384 = vmatprep.subr.bf16.mxu0 %v2594_v38  ;;  %v2385_v9 = vpack.c.bf16 %v1118_v58, %v1079_v37 }
 0x27c   : > { %v1232_v18 = vpop.permute.xlu0 %1231  ;;  %v1192_v34 = vpop.permute.xlu1 %1191  ;;  %2428 = vmatpush1.bf16.msra.mxu1 %v2385_v9 }
 0x27d   : > { %v1237_v39 = vsel %vm400_vm6, %v3458_v4, %v1232_v18  ;;  %v1198_v45 = vsel %vm3930_vm0, %v3929_v26, %v1192_v34  ;;  %2386 = vmatpush1.bf16.msra.mxu0 %v2385_v9  ;;  %2416 = vmatprep.subr.bf16.mxu1 %v2594_v38  ;;  %v1804_v4 = vld [vmem:[#allocation2 + $0x228] sm:$0xff]  ;;  %vm3931_vm6 = vcmask 801792  }
 0x27e   : > { %2387 = vmatprep.subr.bf16.mxu0 %v2594_v38  ;;  %v2388_v6 = vpack.c.bf16 %v1198_v45, %v1158_v32  ;;  %v2391_v33 = vpack.c.bf16 %v1804_v4, %v1237_v39 }
 0x280   : > { %v1320_v0 = vpop.permute.xlu0 %1319  ;;  %v1281_v15 = vpop.permute.xlu1 %1280  ;;  %2429 = vmatpush1.bf16.msra.mxu1 %v2388_v6 }
 0x281   : > { %v1326_v16 = vsel %vm1321_vm2, %v3512_v7, %v1320_v0  ;;  %v1286_v17 = vsel %vm427_vm7, %v3479_v63, %v1281_v15  ;;  %2389 = vmatpush1.bf16.msra.mxu0 %v2388_v6  ;;  %2417 = vmatprep.subr.bf16.mxu1 %v2594_v38 }
 0x282   : > { %2390 = vmatprep.subr.bf16.mxu0 %v2594_v38  ;;  %v2394_v63 = vpack.c.bf16 %v1326_v16, %v1286_v17 }
 0x284   : > { %v1400_v23 = vpop.permute.xlu0 %1399  ;;  %v1360_v30 = vpop.permute.xlu1 %1359  ;;  %2430 = vmatpush1.bf16.msra.mxu1 %v2391_v33 }
 0x285   : > { %v1405_v50 = vsel %vm448_vm8, %v3563_v8, %v1400_v23  ;;  %v1366_v60 = vsel %vm3931_vm6, %v3541_v43, %v1360_v30  ;;  %2392 = vmatpush1.bf16.msra.mxu0 %v2391_v33  ;;  %2418 = vmatprep.subr.bf16.mxu1 %v2594_v38 }
 0x286   : > { %2393 = vmatprep.subr.bf16.mxu0 %v2594_v38  ;;  %v2397_v43 = vpack.c.bf16 %v1405_v50, %v1366_v60 }
 0x288   : > { %v1478_v7 = vpop.permute.xlu0 %1477  ;;  %v1439_v44 = vpop.permute.xlu1 %1438  ;;  %2431 = vmatpush1.bf16.msra.mxu1 %v2394_v63 }
 0x289   : > { %v1483_v55 = vsel %vm490_vm10, %v3597_v47, %v1478_v7  ;;  %v1444_v51 = vsel %vm469_vm9, %v3582_v52, %v1439_v44  ;;  %2395 = vmatpush1.bf16.msra.mxu0 %v2394_v63  ;;  %2419 = vmatprep.subr.bf16.mxu1 %v2594_v38 }
 0x28a   : > { %2396 = vmatprep.subr.bf16.mxu0 %v2594_v38  ;;  %v2400_v52 = vpack.c.bf16 %v1483_v55, %v1444_v51 }
 0x28c   : > { %v1557_v8 = vpop.permute.xlu0 %1556  ;;  %v1517_v40 = vpop.permute.xlu1 %1516  ;;  %2432 = vmatpush1.bf16.msra.mxu1 %v2397_v43 }
 0x28d   : > { %v1562_v53 = vsel %vm796_vm11, %v3623_v31, %v1557_v8  ;;  %v1523_v54 = vsel %vm1518_vm5, %v3611_v25, %v1517_v40  ;;  %2398 = vmatpush1.bf16.msra.mxu0 %v2397_v43  ;;  %2420 = vmatprep.subr.bf16.mxu1 %v2594_v38 }
 0x28e   : > { %2399 = vmatprep.subr.bf16.mxu0 %v2594_v38  ;;  %v2403_v25 = vpack.c.bf16 %v1562_v53, %v1523_v54 }
 0x290   : > { %v1635_v47 = vpop.permute.xlu0 %1634  ;;  %v1596_v12 = vpop.permute.xlu1 %1595  ;;  %2433 = vmatpush1.bf16.msra.mxu1 %v2400_v52 }
 0x291   : > { %v1640_v49 = vsel %vm876_vm13, %v3644_v42, %v1635_v47  ;;  %v1601_v21 = vsel %vm836_vm12, %v3639_v22, %v1596_v12  ;;  %2401 = vmatpush1.bf16.msra.mxu0 %v2400_v52  ;;  %2421 = vmatprep.subr.bf16.mxu1 %v2594_v38 }
 0x292   : > { %2402 = vmatprep.subr.bf16.mxu0 %v2594_v38  ;;  %v2406_v22 = vpack.c.bf16 %v1640_v49, %v1601_v21 }
 0x294   : > { %v1713_v31 = vpop.permute.xlu0 %1712  ;;  %v1674_v57 = vpop.permute.xlu1 %1673  ;;  %2434 = vmatpush1.bf16.msra.mxu1 %v2403_v25 }
 0x295   : > { %v1718_v2 = vsel %vm956_vm15, %v3668_v62, %v1713_v31  ;;  %v1679_v27 = vsel %vm916_vm14, %v3653_v28, %v1674_v57  ;;  %2404 = vmatpush1.bf16.msra.mxu0 %v2403_v25  ;;  %2422 = vmatprep.subr.bf16.mxu1 %v2594_v38 }
 0x296   : > { %2405 = vmatprep.subr.bf16.mxu0 %v2594_v38  ;;  %v2409_v42 = vpack.c.bf16 %v1718_v2, %v1679_v27 }
 0x298   : > { %2435 = vmatpush1.bf16.msra.mxu1 %v2406_v22 }
 0x299   : > { %2407 = vmatpush1.bf16.msra.mxu0 %v2406_v22  ;;  %2423 = vmatprep.subr.bf16.mxu1 %v2594_v38 }
 0x29a   : > { %2408 = vmatprep.subr.bf16.mxu0 %v2594_v38 }
 0x29c   : > { %2436 = vmatpush1.bf16.msra.mxu1 %v2409_v42 }
 0x29d   : > { %2410 = vmatpush1.bf16.msra.mxu0 %v2409_v42 }
 0x29f   : > { %2129 = vmatmul.mubr.f32.vlgmr.msra.gmra.mrb[8].mxu1 %v3674_v20 }
 0x2a0   : > { %2124 = vmatmul.mubr.f32.vlgmr.msra.gmra.mrb[10].mxu0 %v3658_v61  ;;  %2258 = vmatprep.mubr.msk.f32.mxu1 %vm1883_vm3, %v3682_v1 }
 0x2a3   : > { %2134 = vmatmul.mubr.f32.gmra.mrb[10].mxu1 %v3690_v56 }
 0x2a5   : > { %v1876_v5 = vpop.permute.xlu0 %1875 }
 0x2a6   : > { %v1871_v28 = vpop.permute.xlu1 %1870 }
 0x2aa   : > { %v1881_v29 = vpop.permute.xlu1 %1880 }
 0x336   : > { %v1959_v62 = vpop.f32.mrb[2].mxu1 }
 0x337   : > { %v1961_v35 = vpop.f32.mrb[3].mxu1  ;;  %v1960_v48 = vadd.f32 %v1959_v62, %v1871_v28 }
 0x338   : > { %v1962_v38 = vadd.f32 %v1961_v35, %v1871_v28 }
 0x339   : > { %v2139_v3 = vmax.f32 %v1960_v48, 0.0 }
 0x33a   : > { %v1965_v61 = vpop.f32.mrb[4].mxu1  ;;  %v2140_v20 = vmax.f32 %v1962_v38, 0.0 }
 0x33b   : > { %v1966_v1 = vadd.f32 %v1965_v61, %v1876_v5  ;;  %v1967_v56 = vpop.f32.mrb[5].mxu1  ;;  %2154 = vst [vmem:[%s3785_s20] sm:$0xff] %v2139_v3 }
 0x33c   : > { %v1968_v59 = vadd.f32 %v1967_v56, %v1876_v5  ;;  %2155 = vst [vmem:[%s3785_s20 + $0x8] sm:$0xff] %v2140_v20 }
 0x33d   : > { %v2144_v36 = vmax.f32 %v1966_v1, 0.0 }
 0x33e   : > { %v2145_v37 = vmax.f32 %v1968_v59, 0.0  ;;  %v1971_v11 = vpop.f32.mrb[6].mxu1 }
 0x33f   : > { %2159 = vst [vmem:[%s3785_s20 + $0x28] sm:$0xff] %v2144_v36  ;;  %v2042_v19 = vpop.f32.mrb[4].mxu0  ;;  %v1972_v10 = vadd.f32 %v1971_v11, %v1881_v29  ;;  %v1973_v41 = vpop.f32.mrb[7].mxu1 }
 0x340   : > { %2160 = vst [vmem:[%s3785_s20 + $0x30] sm:$0xff] %v2145_v37  ;;  %v2043_v46 = vadd.f32 %v2042_v19, %v1871_v28  ;;  %v2044_v24 = vpop.f32.mrb[5].mxu0  ;;  %v1974_v13 = vadd.f32 %v1973_v41, %v1881_v29 }
 0x341   : > { %v2045_v32 = vadd.f32 %v2044_v24, %v1871_v28  ;;  %v2149_v14 = vmax.f32 %v1972_v10, 0.0 }
 0x342   : > { %v2141_v58 = vmax.f32 %v2043_v46, 0.0  ;;  %v2150_v9 = vmax.f32 %v1974_v13, 0.0 }
 0x343   : > { %v2142_v18 = vmax.f32 %v2045_v32, 0.0  ;;  %v2048_v34 = vpop.f32.mrb[6].mxu0  ;;  %2164 = vst [vmem:[%s3785_s20 + $0x50] sm:$0xf] %v2149_v14 }
 0x344   : > { %2156 = vst [vmem:[%s3785_s20 + $0x10] sm:$0xff] %v2141_v58  ;;  %v2049_v39 = vadd.f32 %v2048_v34, %v1876_v5  ;;  %v2050_v26 = vpop.f32.mrb[7].mxu0  ;;  %2165 = vst [vmem:[%s3785_s20 + $0x58] sm:$0xf] %v2150_v9 }
 0x345   : > { %2157 = vst [vmem:[%s3785_s20 + $0x18] sm:$0xff] %v2142_v18  ;;  %v2051_v45 = vadd.f32 %v2050_v26, %v1876_v5 }
 0x346   : > { %v2146_v6 = vmax.f32 %v2049_v39, 0.0 }
 0x347   : > { %v2147_v0 = vmax.f32 %v2051_v45, 0.0  ;;  %v2054_v15 = vpop.f32.mrb[8].mxu0 }
 0x348   : > { %2161 = vst [vmem:[%s3785_s20 + $0x38] sm:$0xff] %v2146_v6  ;;  %v2055_v16 = vadd.f32 %v2054_v15, %v1881_v29  ;;  %v2056_v17 = vpop.f32.mrb[9].mxu0 }
 0x349   : > { %2162 = vst [vmem:[%s3785_s20 + $0x40] sm:$0xff] %v2147_v0  ;;  %v2057_v4 = vadd.f32 %v2056_v17, %v1881_v29 }
 0x34a   : > { %v2151_v33 = vmax.f32 %v2055_v16, 0.0 }
 0x34b   : > { %v2152_v23 = vmax.f32 %v2057_v4, 0.0 }
 0x34c   : > { %2166 = vst [vmem:[%s3785_s20 + $0x60] sm:$0xf] %v2151_v33 }
 0x34d   : > { %2167 = vst [vmem:[%s3785_s20 + $0x68] sm:$0xf] %v2152_v23 }
 0x372   : > { %v2130_v30 = vpop.f32.mrb[8].mxu1 }
 0x373   : > { %v2131_v50 = vadd.f32 %v2130_v30, %v1876_v5  ;;  %v2125_v60 = vpop.f32.mrb[10].mxu0  ;;  %v2132_v63 = vpop.f32.mrb[9].mxu1 }
 0x374   : > { %v2126_v7 = vadd.f32 %v2125_v60, %v1871_v28  ;;  %v2127_v44 = vpop.f32.mrb[11].mxu0 }
 0x375   : > { %v2148_v55 = vmax.f32 %v2131_v50, 0.0 }
 0x376   : > { %v2143_v51 = vmax.f32 %v2126_v7, 0.0  ;;  %v2135_v43 = vpop.f32.mrb[10].mxu1 }
 0x377   : > { %2163 = vst [vmem:[%s3785_s20 + $0x48] sm:$0xff] %v2148_v55  ;;  %v2136_v8 = vadd.f32 %v2135_v43, %v1881_v29  ;;  %v2137_v40 = vpop.f32.mrb[11].mxu1 }
 0x378   : > { %2158 = vst [vmem:[%s3785_s20 + $0x20] sm:$0xff] %v2143_v51 }
 0x379   : > { %v2153_v53 = vmax.f32 %v2136_v8, 0.0 }
 0x37b   : > { %2168 = vst [vmem:[%s3785_s20 + $0x70] sm:$0xf] %v2153_v53 }
 0x37c PF: > { %p16_p8 = scmp.ge.s32.totalorder %s2652_s26, 4   ;;  %s3932_s21 = smov %s2561_s22 }
 0x37d   : > { %s3933_s22 = smov %s2565_s23  ;;  %s3934_s23 = smov %s2662_s29 }
 0x37e   : > { %s3935_s24 = smov %s2652_s26  ;;  %18 = sbr.rel (!%p16_p8) target bundleno = 3 (0x3), region = 84 }
 0x385   :  { %2190 = vsyncpa [#allocation6], 1 }
 0x386   :  { %2192 = vsyncpa [#allocation6 + $0x1], 1 }

</bundles_post_ra>
